<compile_context>
chip_gen: v6e
topology: v6e:2x2x1
jax: 0.10.0
libtpu: 0.0.40
codegen_flags: <defaults>
</compile_context>

<pallas_src>
import jax
import jax.numpy as jnp
from jax import lax
from jax.experimental import pallas as pl
from jax.experimental.pallas import tpu as pltpu

# ---------------- config (small synthetic shapes) ----------------
NUM_CAMS   = 2          # batch of camera images == number of cameras
IMG_C      = 3
IMG_H      = 16
IMG_W      = 16
HW         = IMG_H * IMG_W
NUM_SEG    = 4          # semantic classes produced by the segmenter
NUM_POINTS = 64         # lidar points (point-cloud "batch" of 1)
POINT_F    = 4          # x, y, z, reflectance
PFN_C      = 32         # pillar feature channels
BEV        = 4          # BEV grid is BEV x BEV pillars
NUM_PILL   = BEV * BEV
NUM_CLS    = 3          # detector classes
BOX_DIM    = 7
HEAD_OUT   = NUM_CLS + BOX_DIM

# packed-parameter slab layout (single VMEM DMA)
SLAB_ROWS  = 40                      # 32 (pfn/head) + 4 (seg) + pad to 8-mult
SLAB_COLS  = 32
_PFN_IN    = POINT_F + NUM_SEG       # 8
_COL_PFN_B = _PFN_IN                 # 8
_COL_HEADW = _PFN_IN + 1             # 9 .. 9+HEAD_OUT
_ROW_SEG   = PFN_C                   # 32 .. 36
_COL_HEADB = 8                       # row 32, cols 8 .. 8+HEAD_OUT


# ==================== fused segmenter + painter + detector ==================
def _pointpainting_kernel(x_ref, pts_ref, proj_ref, slab_ref, cls_ref, box_ref):
    # -------- unpack the single parameter slab (static slices) --------
    pfn_wt = slab_ref[0:PFN_C, 0:_PFN_IN]                        # [32, 8]
    pfn_b  = slab_ref[0:PFN_C, _COL_PFN_B:_COL_PFN_B + 1]        # [32, 1]
    head_w = slab_ref[0:PFN_C, _COL_HEADW:_COL_HEADW + HEAD_OUT] # [32, 10]
    seg_wt = slab_ref[_ROW_SEG:_ROW_SEG + NUM_SEG, 0:IMG_C]      # [4, 3]
    seg_b  = slab_ref[_ROW_SEG:_ROW_SEG + NUM_SEG, IMG_C:IMG_C + 1]  # [4, 1]
    head_b = slab_ref[_ROW_SEG:_ROW_SEG + 1, _COL_HEADB:_COL_HEADB + HEAD_OUT]

    # ---------------- stage 1: segmenter (logits only) ----------------
    # TODO(synk): full DeepLabV3+/ResNet50 backbone replaced by a 1x1-conv head
    # (same output semantics: per-pixel class scores).
    # Tiny-K (K=3) contraction kept off the MXU: unrolled VPU FMAs.
    x = x_ref[...]                                               # [IMG_C, CAMS*HW]
    acc = seg_wt[:, 0:1] * x[0:1, :]
    for k in range(1, IMG_C):
        acc = acc + seg_wt[:, k:k + 1] * x[k:k + 1, :]
    logits = acc + seg_b                                         # [SEG, CAMS*HW]

    # ---------------- stage 2: painter (cam_sync: later cameras win) --------
    px = pts_ref[0:1, :]                                         # [1, N]
    py = pts_ref[1:2, :]
    pz = pts_ref[2:3, :]

    # Per-camera loop only resolves a flat "chosen pixel" index per point.
    chosen = jnp.full((1, NUM_POINTS), -1, jnp.int32)
    for cam in range(NUM_CAMS):                                  # static unroll
        b = cam * 16                                             # flat 4x4 proj (SMEM)
        u_raw = (proj_ref[b + 0] * px + proj_ref[b + 1] * py
                 + proj_ref[b + 2] * pz + proj_ref[b + 3])
        v_raw = (proj_ref[b + 4] * px + proj_ref[b + 5] * py
                 + proj_ref[b + 6] * pz + proj_ref[b + 7])
        d     = (proj_ref[b + 8] * px + proj_ref[b + 9] * py
                 + proj_ref[b + 10] * pz + proj_ref[b + 11])
        d_safe = jnp.where(jnp.abs(d) > 1e-6, d, 1.0)
        inv_d = 1.0 / d_safe                  # exact divide, shared for u and v
        u = u_raw * inv_d
        v = v_raw * inv_d
        ui = jnp.floor(u).astype(jnp.int32)
        vi = jnp.floor(v).astype(jnp.int32)
        valid = ((d > 1e-6)                   # matches the d_safe guard
                 & (ui >= 0) & (ui < IMG_W)
                 & (vi >= 0) & (vi < IMG_H))                     # [1, N]
        pix = jnp.clip(vi * IMG_W + ui, 0, HW - 1)               # [1, N]
        chosen = jnp.where(valid, cam * HW + pix, chosen)        # later cam wins
    any_valid = chosen >= 0                                      # [1, N]

    # Single combined one-hot gather (bf16 MXU; one-hot is exact in bf16).
    # TODO(synk): at real image resolutions switch to an index/DMA gather.
    flat_iota = lax.broadcasted_iota(jnp.int32, (NUM_CAMS * HW, NUM_POINTS), 0)
    onehot = (flat_iota == chosen).astype(jnp.bfloat16)          # [CAMS*HW, N]
    gathered = jnp.dot(logits.astype(jnp.bfloat16), onehot,
                       preferred_element_type=jnp.float32)       # [SEG, N]

    # Softmax only over the gathered columns (per-pixel over classes).
    m = jnp.max(gathered, axis=0, keepdims=True)
    e = jnp.exp(gathered - m)
    inv_den = pl.reciprocal(jnp.sum(e, axis=0, keepdims=True), approx=True)
    scores = jnp.where(any_valid, e * inv_den, 0.0)              # [SEG, N]

    # ---------------- stage 3: detector ----------------
    # TODO(synk): full PointPillars backbone/SSD head + NMS replaced by a
    # per-point MLP, pillar max-pool and a linear class/box head.
    pfn_in = jnp.concatenate([pts_ref[...], scores], axis=0)     # [F+SEG, N]
    feat = jnp.maximum(
        jnp.dot(pfn_wt, pfn_in, preferred_element_type=jnp.float32) + pfn_b,
        0.0)                                                     # [PFN_C, N]

    # pillar assignment (no HBM mask materialization)
    gx = jnp.clip(jnp.floor((px + 4.0) / 2.0).astype(jnp.int32), 0, BEV - 1)
    gy = jnp.clip(jnp.floor((py + 4.0) / 2.0).astype(jnp.int32), 0, BEV - 1)
    pid = gy * BEV + gx                                          # [1, N]

    # per-pillar masked max over the lane (points) axis; 0.0 fill is correct
    # ONLY because feat is post-ReLU (>= 0): empty pillars produce zeros.
    cols = [jnp.max(jnp.where(pid == p, feat, 0.0), axis=-1, keepdims=True)
            for p in range(NUM_PILL)]                            # each [PFN_C, 1]
    pillar_t = jnp.concatenate(cols, axis=-1)                    # [PFN_C, NUM_PILL]

    # head: (pillar_t)^T @ head_w  -> [NUM_PILL, HEAD_OUT]
    out = lax.dot_general(pillar_t, head_w, (((0,), (0,)), ((), ())),
                          preferred_element_type=jnp.float32) + head_b

    # fused epilogue: sigmoid on class logits, split into two outputs
    cls = out[:, :NUM_CLS]
    cls_ref[...] = 1.0 / (1.0 + jnp.exp(-cls))                   # [NUM_PILL, NUM_CLS]
    box_ref[...] = out[:, NUM_CLS:NUM_CLS + BOX_DIM]             # [NUM_PILL, BOX_DIM]


# ---------------- parameter packing (done ONCE, outside jit) -----------------
def pack_params(params):
    slab = jnp.zeros((SLAB_ROWS, SLAB_COLS), jnp.float32)
    slab = slab.at[0:PFN_C, 0:_PFN_IN].set(jnp.transpose(params["pfn_w"]))
    slab = slab.at[0:PFN_C, _COL_PFN_B:_COL_PFN_B + 1].set(
        params["pfn_b"].reshape(PFN_C, 1))
    slab = slab.at[0:PFN_C, _COL_HEADW:_COL_HEADW + HEAD_OUT].set(
        params["head_w"])
    slab = slab.at[_ROW_SEG:_ROW_SEG + NUM_SEG, 0:IMG_C].set(
        jnp.transpose(params["seg_w"]))
    slab = slab.at[_ROW_SEG:_ROW_SEG + NUM_SEG, IMG_C:IMG_C + 1].set(
        params["seg_b"].reshape(NUM_SEG, 1))
    slab = slab.at[_ROW_SEG:_ROW_SEG + 1, _COL_HEADB:_COL_HEADB + HEAD_OUT].set(
        params["head_b"].reshape(1, HEAD_OUT))
    return slab


# ---------------- full forward (mirrors PointPainting.forward) --------------
@jax.jit
def pointpainting_forward(x, y, z, param_slab):
    B, C, H, W = x.shape
    # layout plumbing only: channels-first, long axis (pixels/points) on lanes
    x_all = jnp.transpose(x.reshape(B, C, H * W), (1, 0, 2)).reshape(C, B * H * W)
    pts_t = jnp.transpose(y)                             # [POINT_F, N]
    proj_flat = z.reshape(-1).astype(jnp.float32)        # [NUM_CAMS*16] -> SMEM

    vmem = pl.BlockSpec(memory_space=pltpu.MemorySpace.VMEM)
    smem = pl.BlockSpec(memory_space=pltpu.MemorySpace.SMEM)

    cls_scores, boxes = pl.pallas_call(
        _pointpainting_kernel,
        out_shape=(jax.ShapeDtypeStruct((NUM_PILL, NUM_CLS), jnp.float32),
                   jax.ShapeDtypeStruct((NUM_PILL, BOX_DIM), jnp.float32)),
        in_specs=[vmem, vmem, smem, vmem],
        out_specs=(vmem, vmem),
    )(x_all, pts_t, proj_flat, param_slab)
    return cls_scores, boxes


if __name__ == "__main__":
    key = jax.random.PRNGKey(0)
    k = jax.random.split(key, 8)

    # x: camera images (NCHW), batch == number of cameras
    x = jax.random.normal(k[0], (NUM_CAMS, IMG_C, IMG_H, IMG_W), jnp.float32)

    # y: lidar point cloud [N, (x, y, z, reflectance)]
    pts_xy = jax.random.uniform(k[1], (NUM_POINTS, 2), minval=-4.0, maxval=4.0)
    pts_z = jax.random.uniform(k[2], (NUM_POINTS, 1), minval=1.0, maxval=8.0)
    pts_r = jax.random.uniform(k[3], (NUM_POINTS, 1))
    y = jnp.concatenate([pts_xy, pts_z, pts_r], axis=1).astype(jnp.float32)

    # z: per-camera projection matrices (simple pinhole)
    f, cx, cy = 2.0, IMG_W / 2.0, IMG_H / 2.0
    P = jnp.array([[f, 0.0, cx, 0.0],
                   [0.0, f, cy, 0.0],
                   [0.0, 0.0, 1.0, 0.0],
                   [0.0, 0.0, 0.0, 1.0]], jnp.float32)
    z = jnp.stack([P, P.at[0, 3].set(1.0)], axis=0)      # [NUM_CAMS, 4, 4]

    # deterministic synthetic parameters
    params = {
        "seg_w": 0.1 * jax.random.normal(k[4], (IMG_C, NUM_SEG), jnp.float32),
        "seg_b": jnp.zeros((1, NUM_SEG), jnp.float32),
        "pfn_w": 0.1 * jax.random.normal(k[5], (POINT_F + NUM_SEG, PFN_C),
                                         jnp.float32),
        "pfn_b": jnp.zeros((1, PFN_C), jnp.float32),
        "head_w": 0.1 * jax.random.normal(k[6], (PFN_C, HEAD_OUT), jnp.float32),
        "head_b": jnp.zeros((1, HEAD_OUT), jnp.float32),
    }
    param_slab = pack_params(params)                     # one-time packing

    cls_scores, boxes = pointpainting_forward(x, y, z, param_slab)
    jax.block_until_ready((cls_scores, boxes))
    assert cls_scores.shape == (NUM_PILL, NUM_CLS)
    assert boxes.shape == (NUM_PILL, BOX_DIM)
    print("KERNEL_OK")
</pallas_src>

<mosaic_0001>
module attributes {stable_mosaic.version = 11 : i64} {
  func.func @_pointpainting_kernel(%arg0: memref<3x512xf32, #tpu.memory_space<vmem>>, %arg1: memref<4x64xf32, #tpu.memory_space<vmem>>, %arg2: memref<32xf32, #tpu.memory_space<smem>>, %arg3: memref<40x32xf32, #tpu.memory_space<vmem>>, %arg4: memref<16x3xf32, #tpu.memory_space<vmem>>, %arg5: memref<16x7xf32, #tpu.memory_space<vmem>>) attributes {dimension_semantics = [], scalar_prefetch = 0 : i64, scratch_operands = 0 : i64, tpu.core_type = #tpu.core_type<tc>} {
    %c0 = arith.constant 0 : index
    %c0_0 = arith.constant 0 : index
    %0 = vector.load %arg3[%c0, %c0_0] : memref<40x32xf32, #tpu.memory_space<vmem>>, vector<32x8xf32>
    %c0_1 = arith.constant 0 : index
    %c8 = arith.constant 8 : index
    %1 = vector.load %arg3[%c0_1, %c8] : memref<40x32xf32, #tpu.memory_space<vmem>>, vector<32x1xf32>
    %c0_2 = arith.constant 0 : index
    %c9 = arith.constant 9 : index
    %2 = vector.load %arg3[%c0_2, %c9] : memref<40x32xf32, #tpu.memory_space<vmem>>, vector<32x10xf32>
    %c32 = arith.constant 32 : index
    %c0_3 = arith.constant 0 : index
    %3 = vector.load %arg3[%c32, %c0_3] : memref<40x32xf32, #tpu.memory_space<vmem>>, vector<4x3xf32>
    %c32_4 = arith.constant 32 : index
    %c3 = arith.constant 3 : index
    %4 = vector.load %arg3[%c32_4, %c3] : memref<40x32xf32, #tpu.memory_space<vmem>>, vector<4x1xf32>
    %c32_5 = arith.constant 32 : index
    %c8_6 = arith.constant 8 : index
    %5 = vector.load %arg3[%c32_5, %c8_6] : memref<40x32xf32, #tpu.memory_space<vmem>>, vector<1x10xf32>
    %c0_7 = arith.constant 0 : index
    %c0_8 = arith.constant 0 : index
    %6 = vector.load %arg0[%c0_7, %c0_8] : memref<3x512xf32, #tpu.memory_space<vmem>>, vector<3x512xf32>
    %7 = vector.extract_strided_slice %3 {offsets = [0, 0], sizes = [4, 1], strides = [1, 1]} : vector<4x3xf32> to vector<4x1xf32>
    %8 = vector.extract_strided_slice %6 {offsets = [0, 0], sizes = [1, 512], strides = [1, 1]} : vector<3x512xf32> to vector<1x512xf32>
    %9 = vector.broadcast %7 : vector<4x1xf32> to vector<4x512xf32>
    %10 = vector.broadcast %8 : vector<1x512xf32> to vector<4x512xf32>
    %11 = arith.mulf %9, %10 : vector<4x512xf32>
    %12 = vector.extract_strided_slice %3 {offsets = [0, 1], sizes = [4, 1], strides = [1, 1]} : vector<4x3xf32> to vector<4x1xf32>
    %13 = vector.extract_strided_slice %6 {offsets = [1, 0], sizes = [1, 512], strides = [1, 1]} : vector<3x512xf32> to vector<1x512xf32>
    %14 = vector.broadcast %12 : vector<4x1xf32> to vector<4x512xf32>
    %15 = vector.broadcast %13 : vector<1x512xf32> to vector<4x512xf32>
    %16 = arith.mulf %14, %15 : vector<4x512xf32>
    %17 = arith.addf %11, %16 : vector<4x512xf32>
    %18 = vector.extract_strided_slice %3 {offsets = [0, 2], sizes = [4, 1], strides = [1, 1]} : vector<4x3xf32> to vector<4x1xf32>
    %19 = vector.extract_strided_slice %6 {offsets = [2, 0], sizes = [1, 512], strides = [1, 1]} : vector<3x512xf32> to vector<1x512xf32>
    %20 = vector.broadcast %18 : vector<4x1xf32> to vector<4x512xf32>
    %21 = vector.broadcast %19 : vector<1x512xf32> to vector<4x512xf32>
    %22 = arith.mulf %20, %21 : vector<4x512xf32>
    %23 = arith.addf %17, %22 : vector<4x512xf32>
    %24 = vector.broadcast %4 : vector<4x1xf32> to vector<4x512xf32>
    %25 = arith.addf %23, %24 : vector<4x512xf32>
    %c0_9 = arith.constant 0 : index
    %c0_10 = arith.constant 0 : index
    %26 = vector.load %arg1[%c0_9, %c0_10] : memref<4x64xf32, #tpu.memory_space<vmem>>, vector<1x64xf32>
    %c1 = arith.constant 1 : index
    %c0_11 = arith.constant 0 : index
    %27 = vector.load %arg1[%c1, %c0_11] : memref<4x64xf32, #tpu.memory_space<vmem>>, vector<1x64xf32>
    %c2 = arith.constant 2 : index
    %c0_12 = arith.constant 0 : index
    %28 = vector.load %arg1[%c2, %c0_12] : memref<4x64xf32, #tpu.memory_space<vmem>>, vector<1x64xf32>
    %c-1_i32 = arith.constant -1 : i32
    %29 = vector.broadcast %c-1_i32 : i32 to vector<1x64xi32>
    %c0_13 = arith.constant 0 : index
    %30 = memref.load %arg2[%c0_13] : memref<32xf32, #tpu.memory_space<smem>>
    %31 = vector.broadcast %30 : f32 to vector<1x64xf32>
    %32 = arith.mulf %31, %26 : vector<1x64xf32>
    %c1_14 = arith.constant 1 : index
    %33 = memref.load %arg2[%c1_14] : memref<32xf32, #tpu.memory_space<smem>>
    %34 = vector.broadcast %33 : f32 to vector<1x64xf32>
    %35 = arith.mulf %34, %27 : vector<1x64xf32>
    %36 = arith.addf %32, %35 : vector<1x64xf32>
    %c2_15 = arith.constant 2 : index
    %37 = memref.load %arg2[%c2_15] : memref<32xf32, #tpu.memory_space<smem>>
    %38 = vector.broadcast %37 : f32 to vector<1x64xf32>
    %39 = arith.mulf %38, %28 : vector<1x64xf32>
    %40 = arith.addf %36, %39 : vector<1x64xf32>
    %c3_16 = arith.constant 3 : index
    %41 = memref.load %arg2[%c3_16] : memref<32xf32, #tpu.memory_space<smem>>
    %42 = vector.broadcast %41 : f32 to vector<1x64xf32>
    %43 = arith.addf %40, %42 : vector<1x64xf32>
    %c4 = arith.constant 4 : index
    %44 = memref.load %arg2[%c4] : memref<32xf32, #tpu.memory_space<smem>>
    %45 = vector.broadcast %44 : f32 to vector<1x64xf32>
    %46 = arith.mulf %45, %26 : vector<1x64xf32>
    %c5 = arith.constant 5 : index
    %47 = memref.load %arg2[%c5] : memref<32xf32, #tpu.memory_space<smem>>
    %48 = vector.broadcast %47 : f32 to vector<1x64xf32>
    %49 = arith.mulf %48, %27 : vector<1x64xf32>
    %50 = arith.addf %46, %49 : vector<1x64xf32>
    %c6 = arith.constant 6 : index
    %51 = memref.load %arg2[%c6] : memref<32xf32, #tpu.memory_space<smem>>
    %52 = vector.broadcast %51 : f32 to vector<1x64xf32>
    %53 = arith.mulf %52, %28 : vector<1x64xf32>
    %54 = arith.addf %50, %53 : vector<1x64xf32>
    %c7 = arith.constant 7 : index
    %55 = memref.load %arg2[%c7] : memref<32xf32, #tpu.memory_space<smem>>
    %56 = vector.broadcast %55 : f32 to vector<1x64xf32>
    %57 = arith.addf %54, %56 : vector<1x64xf32>
    %c8_17 = arith.constant 8 : index
    %58 = memref.load %arg2[%c8_17] : memref<32xf32, #tpu.memory_space<smem>>
    %59 = vector.broadcast %58 : f32 to vector<1x64xf32>
    %60 = arith.mulf %59, %26 : vector<1x64xf32>
    %c9_18 = arith.constant 9 : index
    %61 = memref.load %arg2[%c9_18] : memref<32xf32, #tpu.memory_space<smem>>
    %62 = vector.broadcast %61 : f32 to vector<1x64xf32>
    %63 = arith.mulf %62, %27 : vector<1x64xf32>
    %64 = arith.addf %60, %63 : vector<1x64xf32>
    %c10 = arith.constant 10 : index
    %65 = memref.load %arg2[%c10] : memref<32xf32, #tpu.memory_space<smem>>
    %66 = vector.broadcast %65 : f32 to vector<1x64xf32>
    %67 = arith.mulf %66, %28 : vector<1x64xf32>
    %68 = arith.addf %64, %67 : vector<1x64xf32>
    %c11 = arith.constant 11 : index
    %69 = memref.load %arg2[%c11] : memref<32xf32, #tpu.memory_space<smem>>
    %70 = vector.broadcast %69 : f32 to vector<1x64xf32>
    %71 = arith.addf %68, %70 : vector<1x64xf32>
    %72 = math.absf %71 : vector<1x64xf32>
    %cst = arith.constant 9.99999997E-7 : f32
    %73 = vector.broadcast %cst : f32 to vector<1x64xf32>
    %74 = arith.cmpf ogt, %72, %73 : vector<1x64xf32>
    %cst_19 = arith.constant 1.000000e+00 : f32
    %75 = vector.broadcast %cst_19 : f32 to vector<1x64xf32>
    %76 = arith.select %74, %71, %75 : vector<1x64xi1>, vector<1x64xf32>
    %cst_20 = arith.constant 1.000000e+00 : f32
    %77 = vector.broadcast %cst_20 : f32 to vector<1x64xf32>
    %78 = arith.divf %77, %76 : vector<1x64xf32>
    %79 = arith.mulf %43, %78 : vector<1x64xf32>
    %80 = arith.mulf %57, %78 : vector<1x64xf32>
    %81 = math.floor %79 : vector<1x64xf32>
    %82 = arith.fptosi %81 : vector<1x64xf32> to vector<1x64xi32>
    %83 = math.floor %80 : vector<1x64xf32>
    %84 = arith.fptosi %83 : vector<1x64xf32> to vector<1x64xi32>
    %cst_21 = arith.constant 9.99999997E-7 : f32
    %85 = vector.broadcast %cst_21 : f32 to vector<1x64xf32>
    %86 = arith.cmpf ogt, %71, %85 : vector<1x64xf32>
    %c0_i32 = arith.constant 0 : i32
    %87 = vector.broadcast %c0_i32 : i32 to vector<1x64xi32>
    %88 = arith.cmpi sge, %82, %87 : vector<1x64xi32>
    %89 = arith.andi %86, %88 : vector<1x64xi1>
    %c16_i32 = arith.constant 16 : i32
    %90 = vector.broadcast %c16_i32 : i32 to vector<1x64xi32>
    %91 = arith.cmpi slt, %82, %90 : vector<1x64xi32>
    %92 = arith.andi %89, %91 : vector<1x64xi1>
    %c0_i32_22 = arith.constant 0 : i32
    %93 = vector.broadcast %c0_i32_22 : i32 to vector<1x64xi32>
    %94 = arith.cmpi sge, %84, %93 : vector<1x64xi32>
    %95 = arith.andi %92, %94 : vector<1x64xi1>
    %c16_i32_23 = arith.constant 16 : i32
    %96 = vector.broadcast %c16_i32_23 : i32 to vector<1x64xi32>
    %97 = arith.cmpi slt, %84, %96 : vector<1x64xi32>
    %98 = arith.andi %95, %97 : vector<1x64xi1>
    %c16_i32_24 = arith.constant 16 : i32
    %99 = vector.broadcast %c16_i32_24 : i32 to vector<1x64xi32>
    %100 = arith.muli %84, %99 : vector<1x64xi32>
    %101 = arith.addi %100, %82 : vector<1x64xi32>
    %c0_i32_25 = arith.constant 0 : i32
    %c255_i32 = arith.constant 255 : i32
    %102 = vector.broadcast %c0_i32_25 : i32 to vector<1x64xi32>
    %103 = arith.maxsi %102, %101 : vector<1x64xi32>
    %104 = vector.broadcast %c255_i32 : i32 to vector<1x64xi32>
    %105 = arith.minsi %104, %103 : vector<1x64xi32>
    %c0_i32_26 = arith.constant 0 : i32
    %106 = vector.broadcast %c0_i32_26 : i32 to vector<1x64xi32>
    %107 = arith.addi %106, %105 : vector<1x64xi32>
    %108 = arith.select %98, %107, %29 : vector<1x64xi1>, vector<1x64xi32>
    %c16 = arith.constant 16 : index
    %109 = memref.load %arg2[%c16] : memref<32xf32, #tpu.memory_space<smem>>
    %110 = vector.broadcast %109 : f32 to vector<1x64xf32>
    %111 = arith.mulf %110, %26 : vector<1x64xf32>
    %c17 = arith.constant 17 : index
    %112 = memref.load %arg2[%c17] : memref<32xf32, #tpu.memory_space<smem>>
    %113 = vector.broadcast %112 : f32 to vector<1x64xf32>
    %114 = arith.mulf %113, %27 : vector<1x64xf32>
    %115 = arith.addf %111, %114 : vector<1x64xf32>
    %c18 = arith.constant 18 : index
    %116 = memref.load %arg2[%c18] : memref<32xf32, #tpu.memory_space<smem>>
    %117 = vector.broadcast %116 : f32 to vector<1x64xf32>
    %118 = arith.mulf %117, %28 : vector<1x64xf32>
    %119 = arith.addf %115, %118 : vector<1x64xf32>
    %c19 = arith.constant 19 : index
    %120 = memref.load %arg2[%c19] : memref<32xf32, #tpu.memory_space<smem>>
    %121 = vector.broadcast %120 : f32 to vector<1x64xf32>
    %122 = arith.addf %119, %121 : vector<1x64xf32>
    %c20 = arith.constant 20 : index
    %123 = memref.load %arg2[%c20] : memref<32xf32, #tpu.memory_space<smem>>
    %124 = vector.broadcast %123 : f32 to vector<1x64xf32>
    %125 = arith.mulf %124, %26 : vector<1x64xf32>
    %c21 = arith.constant 21 : index
    %126 = memref.load %arg2[%c21] : memref<32xf32, #tpu.memory_space<smem>>
    %127 = vector.broadcast %126 : f32 to vector<1x64xf32>
    %128 = arith.mulf %127, %27 : vector<1x64xf32>
    %129 = arith.addf %125, %128 : vector<1x64xf32>
    %c22 = arith.constant 22 : index
    %130 = memref.load %arg2[%c22] : memref<32xf32, #tpu.memory_space<smem>>
    %131 = vector.broadcast %130 : f32 to vector<1x64xf32>
    %132 = arith.mulf %131, %28 : vector<1x64xf32>
    %133 = arith.addf %129, %132 : vector<1x64xf32>
    %c23 = arith.constant 23 : index
    %134 = memref.load %arg2[%c23] : memref<32xf32, #tpu.memory_space<smem>>
    %135 = vector.broadcast %134 : f32 to vector<1x64xf32>
    %136 = arith.addf %133, %135 : vector<1x64xf32>
    %c24 = arith.constant 24 : index
    %137 = memref.load %arg2[%c24] : memref<32xf32, #tpu.memory_space<smem>>
    %138 = vector.broadcast %137 : f32 to vector<1x64xf32>
    %139 = arith.mulf %138, %26 : vector<1x64xf32>
    %c25 = arith.constant 25 : index
    %140 = memref.load %arg2[%c25] : memref<32xf32, #tpu.memory_space<smem>>
    %141 = vector.broadcast %140 : f32 to vector<1x64xf32>
    %142 = arith.mulf %141, %27 : vector<1x64xf32>
    %143 = arith.addf %139, %142 : vector<1x64xf32>
    %c26 = arith.constant 26 : index
    %144 = memref.load %arg2[%c26] : memref<32xf32, #tpu.memory_space<smem>>
    %145 = vector.broadcast %144 : f32 to vector<1x64xf32>
    %146 = arith.mulf %145, %28 : vector<1x64xf32>
    %147 = arith.addf %143, %146 : vector<1x64xf32>
    %c27 = arith.constant 27 : index
    %148 = memref.load %arg2[%c27] : memref<32xf32, #tpu.memory_space<smem>>
    %149 = vector.broadcast %148 : f32 to vector<1x64xf32>
    %150 = arith.addf %147, %149 : vector<1x64xf32>
    %151 = math.absf %150 : vector<1x64xf32>
    %cst_27 = arith.constant 9.99999997E-7 : f32
    %152 = vector.broadcast %cst_27 : f32 to vector<1x64xf32>
    %153 = arith.cmpf ogt, %151, %152 : vector<1x64xf32>
    %cst_28 = arith.constant 1.000000e+00 : f32
    %154 = vector.broadcast %cst_28 : f32 to vector<1x64xf32>
    %155 = arith.select %153, %150, %154 : vector<1x64xi1>, vector<1x64xf32>
    %cst_29 = arith.constant 1.000000e+00 : f32
    %156 = vector.broadcast %cst_29 : f32 to vector<1x64xf32>
    %157 = arith.divf %156, %155 : vector<1x64xf32>
    %158 = arith.mulf %122, %157 : vector<1x64xf32>
    %159 = arith.mulf %136, %157 : vector<1x64xf32>
    %160 = math.floor %158 : vector<1x64xf32>
    %161 = arith.fptosi %160 : vector<1x64xf32> to vector<1x64xi32>
    %162 = math.floor %159 : vector<1x64xf32>
    %163 = arith.fptosi %162 : vector<1x64xf32> to vector<1x64xi32>
    %cst_30 = arith.constant 9.99999997E-7 : f32
    %164 = vector.broadcast %cst_30 : f32 to vector<1x64xf32>
    %165 = arith.cmpf ogt, %150, %164 : vector<1x64xf32>
    %c0_i32_31 = arith.constant 0 : i32
    %166 = vector.broadcast %c0_i32_31 : i32 to vector<1x64xi32>
    %167 = arith.cmpi sge, %161, %166 : vector<1x64xi32>
    %168 = arith.andi %165, %167 : vector<1x64xi1>
    %c16_i32_32 = arith.constant 16 : i32
    %169 = vector.broadcast %c16_i32_32 : i32 to vector<1x64xi32>
    %170 = arith.cmpi slt, %161, %169 : vector<1x64xi32>
    %171 = arith.andi %168, %170 : vector<1x64xi1>
    %c0_i32_33 = arith.constant 0 : i32
    %172 = vector.broadcast %c0_i32_33 : i32 to vector<1x64xi32>
    %173 = arith.cmpi sge, %163, %172 : vector<1x64xi32>
    %174 = arith.andi %171, %173 : vector<1x64xi1>
    %c16_i32_34 = arith.constant 16 : i32
    %175 = vector.broadcast %c16_i32_34 : i32 to vector<1x64xi32>
    %176 = arith.cmpi slt, %163, %175 : vector<1x64xi32>
    %177 = arith.andi %174, %176 : vector<1x64xi1>
    %c16_i32_35 = arith.constant 16 : i32
    %178 = vector.broadcast %c16_i32_35 : i32 to vector<1x64xi32>
    %179 = arith.muli %163, %178 : vector<1x64xi32>
    %180 = arith.addi %179, %161 : vector<1x64xi32>
    %c0_i32_36 = arith.constant 0 : i32
    %c255_i32_37 = arith.constant 255 : i32
    %181 = vector.broadcast %c0_i32_36 : i32 to vector<1x64xi32>
    %182 = arith.maxsi %181, %180 : vector<1x64xi32>
    %183 = vector.broadcast %c255_i32_37 : i32 to vector<1x64xi32>
    %184 = arith.minsi %183, %182 : vector<1x64xi32>
    %c256_i32 = arith.constant 256 : i32
    %185 = vector.broadcast %c256_i32 : i32 to vector<1x64xi32>
    %186 = arith.addi %185, %184 : vector<1x64xi32>
    %187 = arith.select %177, %186, %108 : vector<1x64xi1>, vector<1x64xi32>
    %c0_i32_38 = arith.constant 0 : i32
    %188 = vector.broadcast %c0_i32_38 : i32 to vector<1x64xi32>
    %189 = arith.cmpi sge, %187, %188 : vector<1x64xi32>
    %190 = tpu.iota {dimensions = array<i32: 0>} : vector<512x64xi32>
    %191 = vector.broadcast %187 : vector<1x64xi32> to vector<512x64xi32>
    %192 = arith.cmpi eq, %190, %191 : vector<512x64xi32>
    %193 = arith.extui %192 : vector<512x64xi1> to vector<512x64xi32>
    %194 = arith.sitofp %193 : vector<512x64xi32> to vector<512x64xf32>
    %195 = arith.truncf %194 : vector<512x64xf32> to vector<512x64xbf16>
    %196 = arith.truncf %25 : vector<4x512xf32> to vector<4x512xbf16>
    %cst_39 = arith.constant dense<0.000000e+00> : vector<4x64xf32>
    %197 = tpu.matmul %196, %195, %cst_39 {dimension_numbers = #tpu.dot_dimension_numbers<[1], [0], [0], [1], [0, 0, 1, 1], [], []>} : vector<4x512xbf16>, vector<512x64xbf16>, vector<4x64xf32> -> vector<4x64xf32>
    %cst_40 = arith.constant dense<0xFF800000> : vector<64xf32>
    %198 = vector.multi_reduction <maximumf>, %197, %cst_40 [0] : vector<4x64xf32> to vector<64xf32>
    %199 = vector.shape_cast %198 : vector<64xf32> to vector<1x64xf32>
    %200 = vector.broadcast %199 : vector<1x64xf32> to vector<4x64xf32>
    %201 = arith.subf %197, %200 : vector<4x64xf32>
    %202 = math.exp %201 : vector<4x64xf32>
    %cst_41 = arith.constant dense<0.000000e+00> : vector<64xf32>
    %203 = vector.multi_reduction <add>, %202, %cst_41 [0] : vector<4x64xf32> to vector<64xf32>
    %204 = vector.shape_cast %203 : vector<64xf32> to vector<1x64xf32>
    %205 = tpu.reciprocal %204 {approx = true} : vector<1x64xf32> -> vector<1x64xf32>
    %206 = vector.broadcast %205 : vector<1x64xf32> to vector<4x64xf32>
    %207 = arith.mulf %202, %206 : vector<4x64xf32>
    %cst_42 = arith.constant 0.000000e+00 : f32
    %208 = vector.shape_cast %189 : vector<1x64xi1> to vector<1x64xi1>
    %209 = vector.broadcast %208 : vector<1x64xi1> to vector<4x64xi1>
    %210 = vector.broadcast %cst_42 : f32 to vector<4x64xf32>
    %211 = arith.select %209, %207, %210 : vector<4x64xi1>, vector<4x64xf32>
    %c0_43 = arith.constant 0 : index
    %c0_44 = arith.constant 0 : index
    %212 = vector.load %arg1[%c0_43, %c0_44] : memref<4x64xf32, #tpu.memory_space<vmem>>, vector<4x64xf32>
    %213 = tpu.concatenate %212, %211 in 0 : vector<4x64xf32>, vector<4x64xf32> -> vector<8x64xf32>
    %cst_45 = arith.constant dense<0.000000e+00> : vector<32x64xf32>
    %214 = tpu.matmul %0, %213, %cst_45 {dimension_numbers = #tpu.dot_dimension_numbers<[1], [0], [0], [1], [0, 0, 1, 1], [], []>} : vector<32x8xf32>, vector<8x64xf32>, vector<32x64xf32> -> vector<32x64xf32>
    %215 = vector.broadcast %1 : vector<32x1xf32> to vector<32x64xf32>
    %216 = arith.addf %214, %215 : vector<32x64xf32>
    %cst_46 = arith.constant 0.000000e+00 : f32
    %217 = vector.broadcast %cst_46 : f32 to vector<32x64xf32>
    %218 = arith.maximumf %216, %217 : vector<32x64xf32>
    %cst_47 = arith.constant 4.000000e+00 : f32
    %219 = vector.broadcast %cst_47 : f32 to vector<1x64xf32>
    %220 = arith.addf %26, %219 : vector<1x64xf32>
    %cst_48 = arith.constant 2.000000e+00 : f32
    %221 = vector.broadcast %cst_48 : f32 to vector<1x64xf32>
    %222 = arith.divf %220, %221 : vector<1x64xf32>
    %223 = math.floor %222 : vector<1x64xf32>
    %224 = arith.fptosi %223 : vector<1x64xf32> to vector<1x64xi32>
    %c0_i32_49 = arith.constant 0 : i32
    %c3_i32 = arith.constant 3 : i32
    %225 = vector.broadcast %c0_i32_49 : i32 to vector<1x64xi32>
    %226 = arith.maxsi %225, %224 : vector<1x64xi32>
    %227 = vector.broadcast %c3_i32 : i32 to vector<1x64xi32>
    %228 = arith.minsi %227, %226 : vector<1x64xi32>
    %cst_50 = arith.constant 4.000000e+00 : f32
    %229 = vector.broadcast %cst_50 : f32 to vector<1x64xf32>
    %230 = arith.addf %27, %229 : vector<1x64xf32>
    %cst_51 = arith.constant 2.000000e+00 : f32
    %231 = vector.broadcast %cst_51 : f32 to vector<1x64xf32>
    %232 = arith.divf %230, %231 : vector<1x64xf32>
    %233 = math.floor %232 : vector<1x64xf32>
    %234 = arith.fptosi %233 : vector<1x64xf32> to vector<1x64xi32>
    %c0_i32_52 = arith.constant 0 : i32
    %c3_i32_53 = arith.constant 3 : i32
    %235 = vector.broadcast %c0_i32_52 : i32 to vector<1x64xi32>
    %236 = arith.maxsi %235, %234 : vector<1x64xi32>
    %237 = vector.broadcast %c3_i32_53 : i32 to vector<1x64xi32>
    %238 = arith.minsi %237, %236 : vector<1x64xi32>
    %c4_i32 = arith.constant 4 : i32
    %239 = vector.broadcast %c4_i32 : i32 to vector<1x64xi32>
    %240 = arith.muli %238, %239 : vector<1x64xi32>
    %241 = arith.addi %240, %228 : vector<1x64xi32>
    %c0_i32_54 = arith.constant 0 : i32
    %242 = vector.broadcast %c0_i32_54 : i32 to vector<1x64xi32>
    %243 = arith.cmpi eq, %241, %242 : vector<1x64xi32>
    %cst_55 = arith.constant 0.000000e+00 : f32
    %244 = vector.shape_cast %243 : vector<1x64xi1> to vector<1x64xi1>
    %245 = vector.broadcast %244 : vector<1x64xi1> to vector<32x64xi1>
    %246 = vector.broadcast %cst_55 : f32 to vector<32x64xf32>
    %247 = arith.select %245, %218, %246 : vector<32x64xi1>, vector<32x64xf32>
    %cst_56 = arith.constant dense<0xFF800000> : vector<32xf32>
    %248 = vector.multi_reduction <maximumf>, %247, %cst_56 [1] : vector<32x64xf32> to vector<32xf32>
    %249 = vector.shape_cast %248 : vector<32xf32> to vector<32x1xf32>
    %c1_i32 = arith.constant 1 : i32
    %250 = vector.broadcast %c1_i32 : i32 to vector<1x64xi32>
    %251 = arith.cmpi eq, %241, %250 : vector<1x64xi32>
    %cst_57 = arith.constant 0.000000e+00 : f32
    %252 = vector.shape_cast %251 : vector<1x64xi1> to vector<1x64xi1>
    %253 = vector.broadcast %252 : vector<1x64xi1> to vector<32x64xi1>
    %254 = vector.broadcast %cst_57 : f32 to vector<32x64xf32>
    %255 = arith.select %253, %218, %254 : vector<32x64xi1>, vector<32x64xf32>
    %cst_58 = arith.constant dense<0xFF800000> : vector<32xf32>
    %256 = vector.multi_reduction <maximumf>, %255, %cst_58 [1] : vector<32x64xf32> to vector<32xf32>
    %257 = vector.shape_cast %256 : vector<32xf32> to vector<32x1xf32>
    %c2_i32 = arith.constant 2 : i32
    %258 = vector.broadcast %c2_i32 : i32 to vector<1x64xi32>
    %259 = arith.cmpi eq, %241, %258 : vector<1x64xi32>
    %cst_59 = arith.constant 0.000000e+00 : f32
    %260 = vector.shape_cast %259 : vector<1x64xi1> to vector<1x64xi1>
    %261 = vector.broadcast %260 : vector<1x64xi1> to vector<32x64xi1>
    %262 = vector.broadcast %cst_59 : f32 to vector<32x64xf32>
    %263 = arith.select %261, %218, %262 : vector<32x64xi1>, vector<32x64xf32>
    %cst_60 = arith.constant dense<0xFF800000> : vector<32xf32>
    %264 = vector.multi_reduction <maximumf>, %263, %cst_60 [1] : vector<32x64xf32> to vector<32xf32>
    %265 = vector.shape_cast %264 : vector<32xf32> to vector<32x1xf32>
    %c3_i32_61 = arith.constant 3 : i32
    %266 = vector.broadcast %c3_i32_61 : i32 to vector<1x64xi32>
    %267 = arith.cmpi eq, %241, %266 : vector<1x64xi32>
    %cst_62 = arith.constant 0.000000e+00 : f32
    %268 = vector.shape_cast %267 : vector<1x64xi1> to vector<1x64xi1>
    %269 = vector.broadcast %268 : vector<1x64xi1> to vector<32x64xi1>
    %270 = vector.broadcast %cst_62 : f32 to vector<32x64xf32>
    %271 = arith.select %269, %218, %270 : vector<32x64xi1>, vector<32x64xf32>
    %cst_63 = arith.constant dense<0xFF800000> : vector<32xf32>
    %272 = vector.multi_reduction <maximumf>, %271, %cst_63 [1] : vector<32x64xf32> to vector<32xf32>
    %273 = vector.shape_cast %272 : vector<32xf32> to vector<32x1xf32>
    %c4_i32_64 = arith.constant 4 : i32
    %274 = vector.broadcast %c4_i32_64 : i32 to vector<1x64xi32>
    %275 = arith.cmpi eq, %241, %274 : vector<1x64xi32>
    %cst_65 = arith.constant 0.000000e+00 : f32
    %276 = vector.shape_cast %275 : vector<1x64xi1> to vector<1x64xi1>
    %277 = vector.broadcast %276 : vector<1x64xi1> to vector<32x64xi1>
    %278 = vector.broadcast %cst_65 : f32 to vector<32x64xf32>
    %279 = arith.select %277, %218, %278 : vector<32x64xi1>, vector<32x64xf32>
    %cst_66 = arith.constant dense<0xFF800000> : vector<32xf32>
    %280 = vector.multi_reduction <maximumf>, %279, %cst_66 [1] : vector<32x64xf32> to vector<32xf32>
    %281 = vector.shape_cast %280 : vector<32xf32> to vector<32x1xf32>
    %c5_i32 = arith.constant 5 : i32
    %282 = vector.broadcast %c5_i32 : i32 to vector<1x64xi32>
    %283 = arith.cmpi eq, %241, %282 : vector<1x64xi32>
    %cst_67 = arith.constant 0.000000e+00 : f32
    %284 = vector.shape_cast %283 : vector<1x64xi1> to vector<1x64xi1>
    %285 = vector.broadcast %284 : vector<1x64xi1> to vector<32x64xi1>
    %286 = vector.broadcast %cst_67 : f32 to vector<32x64xf32>
    %287 = arith.select %285, %218, %286 : vector<32x64xi1>, vector<32x64xf32>
    %cst_68 = arith.constant dense<0xFF800000> : vector<32xf32>
    %288 = vector.multi_reduction <maximumf>, %287, %cst_68 [1] : vector<32x64xf32> to vector<32xf32>
    %289 = vector.shape_cast %288 : vector<32xf32> to vector<32x1xf32>
    %c6_i32 = arith.constant 6 : i32
    %290 = vector.broadcast %c6_i32 : i32 to vector<1x64xi32>
    %291 = arith.cmpi eq, %241, %290 : vector<1x64xi32>
    %cst_69 = arith.constant 0.000000e+00 : f32
    %292 = vector.shape_cast %291 : vector<1x64xi1> to vector<1x64xi1>
    %293 = vector.broadcast %292 : vector<1x64xi1> to vector<32x64xi1>
    %294 = vector.broadcast %cst_69 : f32 to vector<32x64xf32>
    %295 = arith.select %293, %218, %294 : vector<32x64xi1>, vector<32x64xf32>
    %cst_70 = arith.constant dense<0xFF800000> : vector<32xf32>
    %296 = vector.multi_reduction <maximumf>, %295, %cst_70 [1] : vector<32x64xf32> to vector<32xf32>
    %297 = vector.shape_cast %296 : vector<32xf32> to vector<32x1xf32>
    %c7_i32 = arith.constant 7 : i32
    %298 = vector.broadcast %c7_i32 : i32 to vector<1x64xi32>
    %299 = arith.cmpi eq, %241, %298 : vector<1x64xi32>
    %cst_71 = arith.constant 0.000000e+00 : f32
    %300 = vector.shape_cast %299 : vector<1x64xi1> to vector<1x64xi1>
    %301 = vector.broadcast %300 : vector<1x64xi1> to vector<32x64xi1>
    %302 = vector.broadcast %cst_71 : f32 to vector<32x64xf32>
    %303 = arith.select %301, %218, %302 : vector<32x64xi1>, vector<32x64xf32>
    %cst_72 = arith.constant dense<0xFF800000> : vector<32xf32>
    %304 = vector.multi_reduction <maximumf>, %303, %cst_72 [1] : vector<32x64xf32> to vector<32xf32>
    %305 = vector.shape_cast %304 : vector<32xf32> to vector<32x1xf32>
    %c8_i32 = arith.constant 8 : i32
    %306 = vector.broadcast %c8_i32 : i32 to vector<1x64xi32>
    %307 = arith.cmpi eq, %241, %306 : vector<1x64xi32>
    %cst_73 = arith.constant 0.000000e+00 : f32
    %308 = vector.shape_cast %307 : vector<1x64xi1> to vector<1x64xi1>
    %309 = vector.broadcast %308 : vector<1x64xi1> to vector<32x64xi1>
    %310 = vector.broadcast %cst_73 : f32 to vector<32x64xf32>
    %311 = arith.select %309, %218, %310 : vector<32x64xi1>, vector<32x64xf32>
    %cst_74 = arith.constant dense<0xFF800000> : vector<32xf32>
    %312 = vector.multi_reduction <maximumf>, %311, %cst_74 [1] : vector<32x64xf32> to vector<32xf32>
    %313 = vector.shape_cast %312 : vector<32xf32> to vector<32x1xf32>
    %c9_i32 = arith.constant 9 : i32
    %314 = vector.broadcast %c9_i32 : i32 to vector<1x64xi32>
    %315 = arith.cmpi eq, %241, %314 : vector<1x64xi32>
    %cst_75 = arith.constant 0.000000e+00 : f32
    %316 = vector.shape_cast %315 : vector<1x64xi1> to vector<1x64xi1>
    %317 = vector.broadcast %316 : vector<1x64xi1> to vector<32x64xi1>
    %318 = vector.broadcast %cst_75 : f32 to vector<32x64xf32>
    %319 = arith.select %317, %218, %318 : vector<32x64xi1>, vector<32x64xf32>
    %cst_76 = arith.constant dense<0xFF800000> : vector<32xf32>
    %320 = vector.multi_reduction <maximumf>, %319, %cst_76 [1] : vector<32x64xf32> to vector<32xf32>
    %321 = vector.shape_cast %320 : vector<32xf32> to vector<32x1xf32>
    %c10_i32 = arith.constant 10 : i32
    %322 = vector.broadcast %c10_i32 : i32 to vector<1x64xi32>
    %323 = arith.cmpi eq, %241, %322 : vector<1x64xi32>
    %cst_77 = arith.constant 0.000000e+00 : f32
    %324 = vector.shape_cast %323 : vector<1x64xi1> to vector<1x64xi1>
    %325 = vector.broadcast %324 : vector<1x64xi1> to vector<32x64xi1>
    %326 = vector.broadcast %cst_77 : f32 to vector<32x64xf32>
    %327 = arith.select %325, %218, %326 : vector<32x64xi1>, vector<32x64xf32>
    %cst_78 = arith.constant dense<0xFF800000> : vector<32xf32>
    %328 = vector.multi_reduction <maximumf>, %327, %cst_78 [1] : vector<32x64xf32> to vector<32xf32>
    %329 = vector.shape_cast %328 : vector<32xf32> to vector<32x1xf32>
    %c11_i32 = arith.constant 11 : i32
    %330 = vector.broadcast %c11_i32 : i32 to vector<1x64xi32>
    %331 = arith.cmpi eq, %241, %330 : vector<1x64xi32>
    %cst_79 = arith.constant 0.000000e+00 : f32
    %332 = vector.shape_cast %331 : vector<1x64xi1> to vector<1x64xi1>
    %333 = vector.broadcast %332 : vector<1x64xi1> to vector<32x64xi1>
    %334 = vector.broadcast %cst_79 : f32 to vector<32x64xf32>
    %335 = arith.select %333, %218, %334 : vector<32x64xi1>, vector<32x64xf32>
    %cst_80 = arith.constant dense<0xFF800000> : vector<32xf32>
    %336 = vector.multi_reduction <maximumf>, %335, %cst_80 [1] : vector<32x64xf32> to vector<32xf32>
    %337 = vector.shape_cast %336 : vector<32xf32> to vector<32x1xf32>
    %c12_i32 = arith.constant 12 : i32
    %338 = vector.broadcast %c12_i32 : i32 to vector<1x64xi32>
    %339 = arith.cmpi eq, %241, %338 : vector<1x64xi32>
    %cst_81 = arith.constant 0.000000e+00 : f32
    %340 = vector.shape_cast %339 : vector<1x64xi1> to vector<1x64xi1>
    %341 = vector.broadcast %340 : vector<1x64xi1> to vector<32x64xi1>
    %342 = vector.broadcast %cst_81 : f32 to vector<32x64xf32>
    %343 = arith.select %341, %218, %342 : vector<32x64xi1>, vector<32x64xf32>
    %cst_82 = arith.constant dense<0xFF800000> : vector<32xf32>
    %344 = vector.multi_reduction <maximumf>, %343, %cst_82 [1] : vector<32x64xf32> to vector<32xf32>
    %345 = vector.shape_cast %344 : vector<32xf32> to vector<32x1xf32>
    %c13_i32 = arith.constant 13 : i32
    %346 = vector.broadcast %c13_i32 : i32 to vector<1x64xi32>
    %347 = arith.cmpi eq, %241, %346 : vector<1x64xi32>
    %cst_83 = arith.constant 0.000000e+00 : f32
    %348 = vector.shape_cast %347 : vector<1x64xi1> to vector<1x64xi1>
    %349 = vector.broadcast %348 : vector<1x64xi1> to vector<32x64xi1>
    %350 = vector.broadcast %cst_83 : f32 to vector<32x64xf32>
    %351 = arith.select %349, %218, %350 : vector<32x64xi1>, vector<32x64xf32>
    %cst_84 = arith.constant dense<0xFF800000> : vector<32xf32>
    %352 = vector.multi_reduction <maximumf>, %351, %cst_84 [1] : vector<32x64xf32> to vector<32xf32>
    %353 = vector.shape_cast %352 : vector<32xf32> to vector<32x1xf32>
    %c14_i32 = arith.constant 14 : i32
    %354 = vector.broadcast %c14_i32 : i32 to vector<1x64xi32>
    %355 = arith.cmpi eq, %241, %354 : vector<1x64xi32>
    %cst_85 = arith.constant 0.000000e+00 : f32
    %356 = vector.shape_cast %355 : vector<1x64xi1> to vector<1x64xi1>
    %357 = vector.broadcast %356 : vector<1x64xi1> to vector<32x64xi1>
    %358 = vector.broadcast %cst_85 : f32 to vector<32x64xf32>
    %359 = arith.select %357, %218, %358 : vector<32x64xi1>, vector<32x64xf32>
    %cst_86 = arith.constant dense<0xFF800000> : vector<32xf32>
    %360 = vector.multi_reduction <maximumf>, %359, %cst_86 [1] : vector<32x64xf32> to vector<32xf32>
    %361 = vector.shape_cast %360 : vector<32xf32> to vector<32x1xf32>
    %c15_i32 = arith.constant 15 : i32
    %362 = vector.broadcast %c15_i32 : i32 to vector<1x64xi32>
    %363 = arith.cmpi eq, %241, %362 : vector<1x64xi32>
    %cst_87 = arith.constant 0.000000e+00 : f32
    %364 = vector.shape_cast %363 : vector<1x64xi1> to vector<1x64xi1>
    %365 = vector.broadcast %364 : vector<1x64xi1> to vector<32x64xi1>
    %366 = vector.broadcast %cst_87 : f32 to vector<32x64xf32>
    %367 = arith.select %365, %218, %366 : vector<32x64xi1>, vector<32x64xf32>
    %cst_88 = arith.constant dense<0xFF800000> : vector<32xf32>
    %368 = vector.multi_reduction <maximumf>, %367, %cst_88 [1] : vector<32x64xf32> to vector<32xf32>
    %369 = vector.shape_cast %368 : vector<32xf32> to vector<32x1xf32>
    %370 = tpu.concatenate %249, %257, %265, %273, %281, %289, %297, %305, %313, %321, %329, %337, %345, %353, %361, %369 in 1 : vector<32x1xf32>, vector<32x1xf32>, vector<32x1xf32>, vector<32x1xf32>, vector<32x1xf32>, vector<32x1xf32>, vector<32x1xf32>, vector<32x1xf32>, vector<32x1xf32>, vector<32x1xf32>, vector<32x1xf32>, vector<32x1xf32>, vector<32x1xf32>, vector<32x1xf32>, vector<32x1xf32>, vector<32x1xf32> -> vector<32x16xf32>
    %cst_89 = arith.constant dense<0.000000e+00> : vector<16x10xf32>
    %371 = tpu.matmul %370, %2, %cst_89 {dimension_numbers = #tpu.dot_dimension_numbers<[0], [0], [1], [1], [0, 1, 1, 1], [], []>} : vector<32x16xf32>, vector<32x10xf32>, vector<16x10xf32> -> vector<16x10xf32>
    %372 = vector.broadcast %5 : vector<1x10xf32> to vector<16x10xf32>
    %373 = arith.addf %371, %372 : vector<16x10xf32>
    %374 = vector.extract_strided_slice %373 {offsets = [0, 0], sizes = [16, 3], strides = [1, 1]} : vector<16x10xf32> to vector<16x3xf32>
    %cst_90 = arith.constant 0.000000e+00 : f32
    %375 = vector.broadcast %cst_90 : f32 to vector<16x3xf32>
    %376 = arith.subf %375, %374 : vector<16x3xf32>
    %377 = math.exp %376 : vector<16x3xf32>
    %cst_91 = arith.constant 1.000000e+00 : f32
    %378 = vector.broadcast %cst_91 : f32 to vector<16x3xf32>
    %379 = arith.addf %378, %377 : vector<16x3xf32>
    %cst_92 = arith.constant 1.000000e+00 : f32
    %380 = vector.broadcast %cst_92 : f32 to vector<16x3xf32>
    %381 = arith.divf %380, %379 : vector<16x3xf32>
    %c0_93 = arith.constant 0 : index
    %c0_94 = arith.constant 0 : index
    %382 = vector.load %arg4[%c0_93, %c0_94] : memref<16x3xf32, #tpu.memory_space<vmem>>, vector<16x3xf32>
    tpu.vector_store %arg4[%c0_93, %c0_94], %381 {strides = array<i32>} : memref<16x3xf32, #tpu.memory_space<vmem>>, vector<16x3xf32>,
    %383 = vector.extract_strided_slice %373 {offsets = [0, 3], sizes = [16, 7], strides = [1, 1]} : vector<16x10xf32> to vector<16x7xf32>
    %c0_95 = arith.constant 0 : index
    %c0_96 = arith.constant 0 : index
    %384 = vector.load %arg5[%c0_95, %c0_96] : memref<16x7xf32, #tpu.memory_space<vmem>>, vector<16x7xf32>
    tpu.vector_store %arg5[%c0_95, %c0_96], %383 {strides = array<i32>} : memref<16x7xf32, #tpu.memory_space<vmem>>, vector<16x7xf32>,
    return
  }
}

</mosaic_0001>

<bundles_post_ra>
// kernel: pointpainting_forward.1
= control target key start
LH: loop header
LB: loop body
LE: loop exit
PB: predicated region body
PF: predicated region fallthrough
CT: control target
= control target key end

     0   :  { %11 = vsyncpa [#allocation3], 0  ;;  %s2791_s0 = inlined_call_operand.vmem [shape: f32[3,512], index: 0, kind: input, shape index: {}]   ;;  %s2792_s1 = inlined_call_operand.vmem [shape: f32[4,64], index: 1, kind: input, shape index: {}]   ;;  %s2793_s2 = inlined_call_operand.vmem [shape: f32[32], index: 2, kind: input, shape index: {}]   ;;  %s2794_s3 = inlined_call_operand.vmem [shape: f32[40,32], index: 3, kind: input, shape index: {}]   ;;  %s2795_s4 = inlined_call_operand.vmem [shape: f32[16,3], index: 4, kind: output, shape index: {0}]   ;;  %s2796_s5 = inlined_call_operand.vmem [shape: f32[16,7], index: 5, kind: output, shape index: {1}]  }
   0x1   :  { %s22_s20 = sshll.u32 %s2793_s2, 4  ;;  %s23_s20 = int_to_ptr.vmem [resolvable:$true] %s22_s20 }
   0x2   :  { %s1769_s21 = scalar_lea.vmem %s23_s20, 16  ;;  %p1774_p1 = scmp.lt.s32.totalorder %s23_s20, %s23_s20 }
   0x3   :  { %p1770_p0 = scmp.ne.s32.totalorder %s23_s20, %s1769_s21  ;;  %p1775_p2 = scmp.lt.s32.totalorder %s1769_s21, %s1769_s21 }
   0x5   :  { %p1776_p3 = por %p1775_p2, %p1774_p1 }
   0x7   :  { %p1777_p4 = pnand %p1776_p3, %p1770_p0 }
   0x9   :  { %1780 = shalt.err (!%p1777_p4)
}
   0xa   :  { %s1783_s22 = smov [#allocation2]  }
   0xb   :  { %25 = dma.vmem_to_smem %s23_s20, 16, %s1783_s22, [#allocation3]  }
   0xc   :  { %1781 = dma.done.wait [#allocation3], 16  }
   0xd   :  { %1782 = vsyncadd [#allocation3], 4294967280 }
   0xe   :  { %31 = sfence }
   0xf   :  { %v37_v0 = vld [vmem:[%s2794_s3 + $0x20] sm:$0xf]  ;;  %v1784_v1 = vmov 0   ;;  %v1785_v2 = vmov 2   ;;  %v1786_v3 = vmov 1   ;;  %v1787_v4 = vmov 3  }
  0x10   :  { %1747 = vset.pattern.permute.xlu0 %v1784_v1  ;;  %1749 = vset.pattern.permute.xlu1 %v1785_v2  ;;  %s1830_s2 = sld [smem:[#allocation2]]  ;;  %v1835_v5 = vld [vmem:[%s2792_s1] sm:$0x1]  ;;  %v1840_v6 = vld [vmem:[%s2792_s1 + $0x1] sm:$0x1] }
  0x11   :  { %43 = vperm.xlu0 %1747, %v37_v0   ;;  %137 = vperm.xlu1 %1749, %v37_v0   ;;  %s1499_s25 = sld [smem:[#allocation2 + $0x8]]  ;;  %v1847_v7 = vld [vmem:[%s2792_s1 + $0x2] sm:$0x1] }
  0x12   :  { %s1500_s26 = sld [smem:[#allocation2 + $0x9]] }
  0x13   :  { %s1501_s27 = sld [smem:[#allocation2 + $0xa]] }
  0x14   :  { %s1502_s28 = sld [smem:[#allocation2 + $0xb]] }
  0x15   :  { %1748 = vset.pattern.permute.xlu0 %v1786_v3  ;;  %1750 = vset.pattern.permute.xlu1 %v1787_v4  ;;  %s1492_s6 = sld [smem:[#allocation2 + $0x1]] }
  0x16   :  { %89 = vperm.xlu0 %1748, %v37_v0   ;;  %185 = vperm.xlu1 %1750, %v37_v0   ;;  %s1842_s9 = sld [smem:[#allocation2 + $0x4]]  ;;  %v196_v17 = vstv %s1830_s2 }
  0x17   :  { %s1496_s12 = sld [smem:[#allocation2 + $0x5]]  ;;  %v224_v8 = vstv %s1499_s25  ;;  %v197_v22 = vmul.f32 %v196_v17, %v1835_v5 }
  0x18   :  { %v225_v9 = vmul.f32 %v224_v8, %v1835_v5  ;;  %v227_v10 = vstv %s1500_s26  ;;  %s1850_s13 = sld [smem:[#allocation2 + $0x2]] }
  0x19   :  { %v228_v11 = vmul.f32 %v227_v10, %v1840_v6  ;;  %v231_v12 = vstv %s1501_s27  ;;  %s1853_s14 = sld [smem:[#allocation2 + $0x3]] }
  0x1a   :  { %v232_v13 = vmul.f32 %v231_v12, %v1847_v7  ;;  %s1856_s15 = sld [smem:[#allocation2 + $0x6]]  ;;  %v235_v15 = vstv %s1502_s28 }
  0x1b   :  { %v229_v14 = vadd.f32 %v228_v11, %v225_v9  ;;  %s1858_s16 = sld [smem:[#allocation2 + $0x7]]  ;;  %v199_v18 = vstv %s1492_s6 }
  0x1c   :  { %s1511_s17 = sld [smem:[#allocation2 + $0x18]]  ;;  %v210_v19 = vstv %s1842_s9  ;;  %v200_v24 = vmul.f32 %v199_v18, %v1840_v6 }
  0x1d   :  { %v233_v16 = vadd.f32 %v232_v13, %v229_v14  ;;  %s1512_s18 = sld [smem:[#allocation2 + $0x19]]  ;;  %v213_v20 = vstv %s1496_s12  ;;  %v211_v26 = vmul.f32 %v210_v19, %v1835_v5 }
  0x1e   :  { %s1513_s19 = sld [smem:[#allocation2 + $0x1a]]  ;;  %v203_v25 = vstv %s1850_s13  ;;  %v214_v27 = vmul.f32 %v213_v20, %v1840_v6  ;;  %v201_v35 = vadd.f32 %v200_v24, %v197_v22 }
  0x1f   :  { %v1862_v21 = vadd.f32 %v235_v15, %v233_v16  ;;  %s1864_s20 = sld [smem:[#allocation2 + $0x1b]]  ;;  %v204_v32 = vmul.f32 %v203_v25, %v1847_v7  ;;  %v207_v44 = vstv %s1853_s14 }
  0x20   :  { %s1868_s21 = sld [smem:[#allocation2 + $0x10]]  ;;  %v217_v28 = vstv %s1856_s15  ;;  %v215_v36 = vadd.f32 %v214_v27, %v211_v26 }
  0x21   :  { %v237_v23 = vand.u32 2147483647, %v1862_v21  ;;  %s1874_s22 = sld [smem:[#allocation2 + $0x11]]  ;;  %v218_v37 = vmul.f32 %v217_v28, %v1847_v7  ;;  %v205_v43 = vadd.f32 %v204_v32, %v201_v35  ;;  %v221_v46 = vstv %s1858_s16 }
  0x22   :  { %s1877_s23 = sld [smem:[#allocation2 + $0x14]]  ;;  %v293_v30 = vstv %s1511_s17  ;;  %vm248_vm2 = vcmp.gt.f32.partialorder %v1862_v21, 1e-06 }
  0x23   :  { %vm238_vm0 = vcmp.gt.f32.partialorder %v237_v23, 1e-06  ;;  %s1880_s24 = sld [smem:[#allocation2 + $0x15]]  ;;  %v296_v31 = vstv %s1512_s18  ;;  %v294_v33 = vmul.f32 %v293_v30, %v1835_v5  ;;  %v219_v45 = vadd.f32 %v218_v37, %v215_v36  ;;  %s1791_s18 = smov 120  }
  0x24   :  { %v239_v29 = vsel %vm238_vm0, %v1862_v21, 1.0  ;;  %v297_v34 = vmul.f32 %v296_v31, %v1840_v6  ;;  %v300_v38 = vstv %s1513_s19  ;;  %s1886_s2 = sld [smem:[#allocation2 + $0x12]]  ;;  %v208_v53 = vadd.f32 %v207_v44, %v205_v43 }
  0x25   :  { %1753 = vrcp.f32 %v239_v29  ;;  %v301_v40 = vmul.f32 %v300_v38, %v1847_v7  ;;  %s1889_s25 = sld [smem:[#allocation2 + $0x16]]  ;;  %v304_v41 = vstv %s1864_s20  ;;  %v222_v54 = vadd.f32 %v221_v46, %v219_v45 }
  0x26   :  { %v298_v39 = vadd.f32 %v297_v34, %v294_v33  ;;  %v265_v47 = vstv %s1868_s21  ;;  %s1506_s26 = sld [smem:[#allocation2 + $0x13]]  ;;  %v48_v33 = vlaneseq }
  0x27   :  { %v268_v48 = vstv %s1874_s22  ;;  %v266_v55 = vmul.f32 %v265_v47, %v1835_v5  ;;  %s1510_s27 = sld [smem:[#allocation2 + $0x17]] }
  0x28   :  { %v302_v42 = vadd.f32 %v301_v40, %v298_v39  ;;  %v279_v50 = vstv %s1877_s23  ;;  %v269_v56 = vmul.f32 %v268_v48, %v1840_v6  ;;  %v1907_v35 = vshrl.u32 %v48_v33, 7 }
  0x29   :  { %v282_v51 = vstv %s1880_s24  ;;  %v280_v58 = vmul.f32 %v279_v50, %v1835_v5 }
  0x2a   :  { %v305_v49 = vadd.f32 %v304_v41, %v302_v42  ;;  %v272_v57 = vstv %s1886_s2  ;;  %v283_v59 = vmul.f32 %v282_v51, %v1840_v6  ;;  %v270_v63 = vadd.f32 %v269_v56, %v266_v55 }
  0x2b   :  { %v286_v60 = vstv %s1889_s25  ;;  %v273_v0 = vmul.f32 %v272_v57, %v1847_v7  ;;  %v1914_v39 = vsub.s32 0, %v1907_v35  ;;  %v366_v43 = vadd.s32 240, %v1907_v35 }
  0x2c   :  { %v306_v52 = vand.u32 2147483647, %v305_v49  ;;  %v284_v4 = vadd.f32 %v283_v59, %v280_v58  ;;  %v287_v8 = vmul.f32 %v286_v60, %v1847_v7  ;;  %v276_v15 = vstv %s1506_s26 }
  0x2d   :  { %v274_v13 = vadd.f32 %v273_v0, %v270_v63  ;;  %v290_v16 = vstv %s1510_s27  ;;  %vm317_vm9 = vcmp.gt.f32.partialorder %v305_v49, 1e-06  ;;  %v367_v44 = vadd.s32 248, %v1907_v35 }
  0x2e   :  { %vm307_vm1 = vcmp.gt.f32.partialorder %v306_v52, 1e-06  ;;  %v288_v14 = vadd.f32 %v287_v8, %v284_v4  ;;  %v398_v45 = vadd.s32 496, %v1907_v35  ;;  %v399_v46 = vadd.s32 504, %v1907_v35 }
  0x2f   :  { %v308_v61 = vsel %vm307_vm1, %v305_v49, 1.0  ;;  %v277_v19 = vadd.f32 %v276_v15, %v274_v13  ;;  %v350_v47 = vadd.s32 112, %v1907_v35  ;;  %v351_v48 = vadd.s32 120, %v1907_v35 }
  0x30   :  { %1755 = vrcp.f32 %v308_v61  ;;  %v291_v20 = vadd.f32 %v290_v16, %v288_v14  ;;  %v382_v50 = vadd.s32 368, %v1907_v35  ;;  %v383_v51 = vadd.s32 376, %v1907_v35 }
  0x31   :  { %v364_v52 = vadd.s32 224, %v1907_v35  ;;  %v396_v55 = vadd.s32 480, %v1907_v35  ;;  %v397_v56 = vadd.s32 488, %v1907_v35  ;;  %v348_v57 = vadd.s32 96, %v1907_v35 }
  0x32   :  { %v1754_v62 = vpop.eup %1753  ;;  %v349_v58 = vadd.s32 104, %v1907_v35  ;;  %v380_v59 = vadd.s32 352, %v1907_v35  ;;  %v381_v60 = vadd.s32 360, %v1907_v35  ;;  %v1788_v61 = vmov 1.0|1.0  }
  0x33   :  { %v242_v2 = vmul.f32 %v1754_v62, %v208_v53  ;;  %v243_v3 = vmul.f32 %v1754_v62, %v222_v54  ;;  %v365_v54 = vadd.s32 232, %v1907_v35  ;;  %v362_v62 = vadd.s32 208, %v1907_v35 }
  0x34   :  { %v363_v63 = vadd.s32 216, %v1907_v35  ;;  %v394_v0 = vadd.s32 464, %v1907_v35  ;;  %v347_v4 = vadd.s32 88, %v1907_v35  ;;  %v378_v8 = vadd.s32 336, %v1907_v35 }
  0x35   :  { %v244_v9 = vfloor.f32 %v242_v2  ;;  %v246_v10 = vfloor.f32 %v243_v3  ;;  %v395_v2 = vadd.s32 472, %v1907_v35  ;;  %v346_v3 = vadd.s32 80, %v1907_v35 }
  0x36   :  { %v393_v13 = vadd.s32 456, %v1907_v35  ;;  %v344_v14 = vadd.s32 64, %v1907_v35  ;;  %v345_v15 = vadd.s32 72, %v1907_v35  ;;  %v376_v16 = vadd.s32 320, %v1907_v35 }
  0x37   :  { %v1724_v11 = vtrunc.f32 %v244_v9  ;;  %v1726_v12 = vtrunc.f32 %v246_v10  ;;  %v379_v9 = vadd.s32 344, %v1907_v35  ;;  %v360_v10 = vadd.s32 192, %v1907_v35 }
  0x38   :  { %v373_v33 = vadd.s32 296, %v1907_v35  ;;  %v386_v36 = vadd.s32 400, %v1907_v35 }
  0x39   :  { %v1727_v17 = vcvt.f32.s32 %v1726_v12  ;;  %v1725_v18 = vcvt.f32.s32 %v1724_v11  ;;  %v361_v11 = vadd.s32 200, %v1907_v35  ;;  %v392_v12 = vadd.s32 448, %v1907_v35 }
  0x3b   :  { %v257_v22 = vmul.u32 16, %v1727_v17  ;;  %vm249_vm3 = vcmp.ge.s32.totalorder %v1725_v18, 0  ;;  %vm251_vm5 = vcmp.lt.s32.totalorder %v1725_v18, 16  ;;  %vm253_vm8 = vcmp.ge.s32.totalorder %v1727_v17, 0 }
  0x3c   :  { %vm250_vm4 = vmand %vm248_vm2, %vm249_vm3  ;;  %vm255_vm13 = vcmp.lt.s32.totalorder %v1727_v17, 16  ;;  %v377_v17 = vadd.s32 328, %v1907_v35 }
  0x3d   :  { %v1756_v23 = vpop.eup %1755  ;;  %v258_v24 = vadd.s32 %v1725_v18, %v257_v22  ;;  %vm252_vm7 = vmand %vm250_vm4, %vm251_vm5  ;;  %v358_v18 = vadd.s32 176, %v1907_v35  ;;  %v391_v22 = vadd.s32 440, %v1907_v35 }
  0x3e   :  { %v311_v25 = vmul.f32 %v1756_v23, %v277_v19  ;;  %v312_v7 = vmul.f32 %v1756_v23, %v291_v20  ;;  %vm254_vm10 = vmand %vm252_vm7, %vm253_vm8  ;;  %v359_v19 = vadd.s32 184, %v1907_v35  ;;  %v390_v20 = vadd.s32 432, %v1907_v35 }
  0x3f   :  { %vm259_vm6 = vcmp.gt.s32.totalorder %v258_v24, 0  ;;  %vm1909_vm2 = vmand %vm254_vm10, %vm255_vm13  ;;  %v342_v23 = vadd.s32 48, %v1907_v35 }
  0x40   :  { %v313_v26 = vfloor.f32 %v311_v25  ;;  %v315_v27 = vfloor.f32 %v312_v7  ;;  %v260_v32 = vsel %vm259_vm6, %v258_v24, 0  ;;  %v343_v24 = vadd.s32 56, %v1907_v35 }
  0x41   :  { %vm261_vm15 = vcmp.lt.s32.totalorder %v260_v32, 255  ;;  %v374_v25 = vadd.s32 304, %v1907_v35  ;;  %v375_v7 = vadd.s32 312, %v1907_v35 }
  0x42   :  { %v1728_v28 = vtrunc.f32 %v313_v26  ;;  %v1730_v29 = vtrunc.f32 %v315_v27  ;;  %v262_v37 = vsel %vm261_vm15, %v260_v32, 255  ;;  %v356_v26 = vadd.s32 160, %v1907_v35 }
  0x43   :  { %v263_v40 = vsel %vm1909_vm2, %v262_v37, 4294967295  ;;  %v357_v27 = vadd.s32 168, %v1907_v35  ;;  %v372_v32 = vadd.s32 288, %v1907_v35  ;;  %v387_v37 = vadd.s32 408, %v1907_v35 }
  0x44   :  { %v1729_v30 = vcvt.f32.s32 %v1728_v28  ;;  %v1731_v31 = vcvt.f32.s32 %v1730_v29  ;;  %v388_v28 = vadd.s32 416, %v1907_v35  ;;  %v389_v29 = vadd.s32 424, %v1907_v35 }
  0x46   :  { %vm318_vm11 = vcmp.ge.s32.totalorder %v1729_v30, 0  ;;  %vm320_vm12 = vcmp.lt.s32.totalorder %v1729_v30, 16  ;;  %v326_v21 = vmul.u32 16, %v1731_v31  ;;  %vm322_vm1 = vcmp.ge.s32.totalorder %v1731_v31, 0 }
  0x47   :  { %vm319_vm14 = vmand %vm317_vm9, %vm318_vm11  ;;  %vm324_vm4 = vcmp.lt.s32.totalorder %v1731_v31, 16  ;;  %v341_v31 = vadd.s32 40, %v1907_v35 }
  0x48   :  { %vm321_vm0 = vmand %vm319_vm14, %vm320_vm12  ;;  %v327_v34 = vadd.s32 %v1729_v30, %v326_v21  ;;  %v340_v30 = vadd.s32 32, %v1907_v35  ;;  %v354_v21 = vadd.s32 144, %v1907_v35 }
  0x49   :  { %vm323_vm3 = vmand %vm321_vm0, %vm322_vm1 }
  0x4a   :  { %vm328_vm5 = vcmp.gt.s32.totalorder %v327_v34, 0  ;;  %vm325_vm7 = vmand %vm323_vm3, %vm324_vm4 }
  0x4b   :  { %v329_v38 = vsel %vm328_vm5, %v327_v34, 0  ;;  %v355_v34 = vadd.s32 152, %v1907_v35 }
  0x4c   :  { %vm330_vm6 = vcmp.lt.s32.totalorder %v329_v38, 255 }
  0x4d   :  { %v331_v41 = vsel %vm330_vm6, %v329_v38, 255  ;;  %v338_v38 = vadd.s32 16, %v1907_v35 }
  0x4e   :  { %v332_v42 = vadd.s32 256, %v331_v41  ;;  %v370_v41 = vadd.s32 272, %v1907_v35 }
  0x50   :  { %v1924_v49 = vsel %vm325_vm7, %v332_v42, %v263_v40  ;;  %v339_v40 = vadd.s32 24, %v1907_v35  ;;  %v371_v42 = vadd.s32 280, %v1907_v35 }
  0x51   :  { %v1931_v53 = vrot.slane %v1924_v49, %v1914_v39 }
  0x53   :  { %vm434_vm8 = vcmp.eq.s32.totalorder %v366_v43, %v1931_v53  ;;  %vm435_vm9 = vcmp.eq.s32.totalorder %v367_v44, %v1931_v53  ;;  %vm466_vm10 = vcmp.eq.s32.totalorder %v398_v45, %v1931_v53  ;;  %vm467_vm11 = vcmp.eq.s32.totalorder %v399_v46, %v1931_v53 }
  0x54   :  { %vm1595_vm12 = vmpackc.low %vm435_vm9, %vm434_vm8  ;;  %vm418_vm13 = vcmp.eq.s32.totalorder %v350_v47, %v1931_v53  ;;  %vm419_vm14 = vcmp.eq.s32.totalorder %v351_v48, %v1931_v53  ;;  %vm450_vm15 = vcmp.eq.s32.totalorder %v382_v50, %v1931_v53  ;;  %vm451_vm0 = vcmp.eq.s32.totalorder %v383_v51, %v1931_v53 }
  0x55   :  { %1650 = vmatprep.subr.msk.bf16.mxu0 %vm1595_vm12, %v1788_v61  ;;  %vm1627_vm1 = vmpackc.low %vm467_vm11, %vm466_vm10  ;;  %vm432_vm2 = vcmp.eq.s32.totalorder %v364_v52, %v1931_v53  ;;  %vm433_vm3 = vcmp.eq.s32.totalorder %v365_v54, %v1931_v53  ;;  %vm464_vm5 = vcmp.eq.s32.totalorder %v396_v55, %v1931_v53  ;;  %vm465_vm6 = vcmp.eq.s32.totalorder %v397_v56, %v1931_v53  ;;  %v39_v52 = vld [vmem:[%s2791_s0] sm:$0x77] }
  0x56   :  { %1672 = vmatprep.subr.msk.bf16.mxu1 %vm1627_vm1, %v1788_v61  ;;  %vm1579_vm4 = vmpackc.low %vm419_vm14, %vm418_vm13  ;;  %vm416_vm8 = vcmp.eq.s32.totalorder %v348_v57, %v1931_v53  ;;  %vm417_vm9 = vcmp.eq.s32.totalorder %v349_v58, %v1931_v53  ;;  %vm448_vm11 = vcmp.eq.s32.totalorder %v380_v59, %v1931_v53  ;;  %vm449_vm12 = vcmp.eq.s32.totalorder %v381_v60, %v1931_v53 }
  0x57   :  { %1651 = vmatpush3.bf16.msk.msra.mxu0 %vm1579_vm4, %v1788_v61  ;;  %vm1611_vm7 = vmpackc.low %vm451_vm0, %vm450_vm15  ;;  %vm430_vm14 = vcmp.eq.s32.totalorder %v362_v62, %v1931_v53  ;;  %vm431_vm15 = vcmp.eq.s32.totalorder %v363_v63, %v1931_v53  ;;  %vm462_vm1 = vcmp.eq.s32.totalorder %v394_v0, %v1931_v53  ;;  %vm414_vm4 = vcmp.eq.s32.totalorder %v346_v3, %v1931_v53 }
  0x58   :  { %1673 = vmatpush3.bf16.msk.msra.mxu1 %vm1611_vm7, %v1788_v61  ;;  %vm1597_vm10 = vmpackc.low %vm433_vm3, %vm432_vm2  ;;  %vm463_vm2 = vcmp.eq.s32.totalorder %v395_v2, %v1931_v53  ;;  %vm446_vm7 = vcmp.eq.s32.totalorder %v378_v8, %v1931_v53  ;;  %v352_v43 = vadd.s32 128, %v1907_v35  ;;  %v353_v44 = vadd.s32 136, %v1907_v35 }
  0x59   :  { %1652 = vmatprep.subr.msk.bf16.mxu0 %vm1597_vm10, %v1788_v61  ;;  %vm1629_vm13 = vmpackc.low %vm465_vm6, %vm464_vm5  ;;  %vm415_vm5 = vcmp.eq.s32.totalorder %v347_v4, %v1931_v53  ;;  %vm428_vm10 = vcmp.eq.s32.totalorder %v360_v10, %v1931_v53  ;;  %v384_v45 = vadd.s32 384, %v1907_v35  ;;  %v385_v46 = vadd.s32 392, %v1907_v35 }
  0x5a   :  { %1674 = vmatprep.subr.msk.bf16.mxu1 %vm1629_vm13, %v1788_v61  ;;  %vm1581_vm0 = vmpackc.low %vm417_vm9, %vm416_vm8  ;;  %vm447_vm8 = vcmp.eq.s32.totalorder %v379_v9, %v1931_v53  ;;  %vm460_vm13 = vcmp.eq.s32.totalorder %v392_v12, %v1931_v53  ;;  %v337_v47 = vadd.s32 8, %v1907_v35  ;;  %v368_v48 = vadd.s32 256, %v1907_v35 }
  0x5b   :  { %1653 = vmatpush3.bf16.msk.msra.mxu0 %vm1581_vm0, %v1788_v61  ;;  %vm1613_vm3 = vmpackc.low %vm449_vm12, %vm448_vm11  ;;  %vm429_vm11 = vcmp.eq.s32.totalorder %v361_v11, %v1931_v53  ;;  %vm412_vm0 = vcmp.eq.s32.totalorder %v344_v14, %v1931_v53  ;;  %v369_v50 = vadd.s32 264, %v1907_v35  ;;  %v54_v51 = vsub.s32 4, %v1907_v35 }
  0x5c   :  { %1675 = vmatpush3.bf16.msk.msra.mxu1 %vm1613_vm3, %v1788_v61  ;;  %vm1599_vm6 = vmpackc.low %vm431_vm15, %vm430_vm14  ;;  %vm461_vm14 = vcmp.eq.s32.totalorder %v393_v13, %v1931_v53  ;;  %vm444_vm3 = vcmp.eq.s32.totalorder %v376_v16, %v1931_v53  ;;  %v142_v54 = vsub.s32 2, %v1907_v35  ;;  %v146_v55 = vsub.s32 6, %v1907_v35 }
  0x5d   :  { %1654 = vmatprep.subr.msk.bf16.mxu0 %vm1599_vm6, %v1788_v61  ;;  %vm1631_vm9 = vmpackc.low %vm463_vm2, %vm462_vm1  ;;  %vm413_vm1 = vcmp.eq.s32.totalorder %v345_v15, %v1931_v53  ;;  %vm426_vm6 = vcmp.eq.s32.totalorder %v358_v18, %v1931_v53  ;;  %v94_v56 = vsub.s32 1, %v1907_v35  ;;  %v98_v57 = vsub.s32 5, %v1907_v35 }
  0x5e   :  { %1676 = vmatprep.subr.msk.bf16.mxu1 %vm1631_vm9, %v1788_v61  ;;  %vm1583_vm12 = vmpackc.low %vm415_vm5, %vm414_vm4  ;;  %vm445_vm4 = vcmp.eq.s32.totalorder %v377_v17, %v1931_v53  ;;  %vm458_vm9 = vcmp.eq.s32.totalorder %v390_v20, %v1931_v53  ;;  %v51_v58 = vrot.slane %v39_v52, %v1914_v39  ;;  %v55_v59 = vrot.slane %v39_v52, %v54_v51 }
  0x5f   :  { %1655 = vmatpush3.bf16.msk.msra.mxu0 %vm1583_vm12, %v1788_v61  ;;  %vm1615_vm15 = vmpackc.low %vm447_vm8, %vm446_vm7  ;;  %vm427_vm7 = vcmp.eq.s32.totalorder %v359_v19, %v1931_v53  ;;  %vm410_vm12 = vcmp.eq.s32.totalorder %v342_v23, %v1931_v53  ;;  %v143_v62 = vrot.slane %v39_v52, %v142_v54  ;;  %v147_v0 = vrot.slane %v39_v52, %v146_v55 }
  0x60   :  { %1677 = vmatpush3.bf16.msk.msra.mxu1 %vm1615_vm15, %v1788_v61  ;;  %vm1601_vm2 = vmpackc.low %vm429_vm11, %vm428_vm10  ;;  %vm459_vm10 = vcmp.eq.s32.totalorder %v391_v22, %v1931_v53  ;;  %vm442_vm15 = vcmp.eq.s32.totalorder %v374_v25, %v1931_v53  ;;  %v95_v3 = vrot.slane %v39_v52, %v94_v56  ;;  %v99_v4 = vrot.slane %v39_v52, %v98_v57 }
  0x61   :  { %1656 = vmatprep.subr.msk.bf16.mxu0 %vm1601_vm2, %v1788_v61  ;;  %vm1633_vm5 = vmpackc.low %vm461_vm14, %vm460_vm13  ;;  %vm411_vm13 = vcmp.eq.s32.totalorder %v343_v24, %v1931_v53  ;;  %vm424_vm2 = vcmp.eq.s32.totalorder %v356_v26, %v1931_v53  ;;  %v71_v10 = vrot.slane %v51_v58, %v1914_v39  ;;  %v75_v11 = vrot.slane %v55_v59, %v1914_v39  ;;  %v2210_v58 = vld [vmem:[%s2794_s3 + $0x10] sm:$0xff]  ;;  %v2216_v59 = vld [vmem:[%s2794_s3 + $0x18] sm:$0xff] }
  0x62   :  { %1678 = vmatprep.subr.msk.bf16.mxu1 %vm1633_vm5, %v1788_v61  ;;  %vm1585_vm8 = vmpackc.low %vm413_vm1, %vm412_vm0  ;;  %vm443_vm0 = vcmp.eq.s32.totalorder %v375_v7, %v1931_v53  ;;  %vm456_vm5 = vcmp.eq.s32.totalorder %v388_v28, %v1931_v53  ;;  %v163_v14 = vrot.slane %v143_v62, %v142_v54  ;;  %v167_v16 = vrot.slane %v147_v0, %v142_v54 }
  0x63   :  { %1657 = vmatpush3.bf16.msk.msra.mxu0 %vm1585_vm8, %v1788_v61  ;;  %vm1617_vm11 = vmpackc.low %vm445_vm4, %vm444_vm3  ;;  %vm425_vm3 = vcmp.eq.s32.totalorder %v357_v27, %v1931_v53  ;;  %vm408_vm8 = vcmp.eq.s32.totalorder %v340_v30, %v1931_v53  ;;  %v115_v18 = vrot.slane %v95_v3, %v94_v56  ;;  %v119_v19 = vrot.slane %v99_v4, %v94_v56 }
  0x64   :  { %1679 = vmatpush3.bf16.msk.msra.mxu1 %vm1617_vm11, %v1788_v61  ;;  %vm1603_vm14 = vmpackc.low %vm427_vm7, %vm426_vm6  ;;  %vm457_vm6 = vcmp.eq.s32.totalorder %v389_v29, %v1931_v53  ;;  %vm440_vm11 = vcmp.eq.s32.totalorder %v372_v32, %v1931_v53 }
  0x65   :  { %1658 = vmatprep.subr.msk.bf16.mxu0 %vm1603_vm14, %v1788_v61  ;;  %vm1635_vm1 = vmpackc.low %vm459_vm10, %vm458_vm9  ;;  %vm409_vm9 = vcmp.eq.s32.totalorder %v341_v31, %v1931_v53  ;;  %vm422_vm14 = vcmp.eq.s32.totalorder %v354_v21, %v1931_v53 }
  0x66   :  { %1680 = vmatprep.subr.msk.bf16.mxu1 %vm1635_vm1, %v1788_v61  ;;  %vm1587_vm4 = vmpackc.low %vm411_vm13, %vm410_vm12  ;;  %vm441_vm12 = vcmp.eq.s32.totalorder %v373_v33, %v1931_v53  ;;  %vm454_vm1 = vcmp.eq.s32.totalorder %v386_v36, %v1931_v53 }
  0x67   :  { %1659 = vmatpush3.bf16.msk.msra.mxu0 %vm1587_vm4, %v1788_v61  ;;  %vm1619_vm7 = vmpackc.low %vm443_vm0, %vm442_vm15  ;;  %vm423_vm15 = vcmp.eq.s32.totalorder %v355_v34, %v1931_v53  ;;  %vm406_vm4 = vcmp.eq.s32.totalorder %v338_v38, %v1931_v53 }
  0x68   :  { %1681 = vmatpush3.bf16.msk.msra.mxu1 %vm1619_vm7, %v1788_v61  ;;  %vm1605_vm10 = vmpackc.low %vm425_vm3, %vm424_vm2  ;;  %vm455_vm2 = vcmp.eq.s32.totalorder %v387_v37, %v1931_v53  ;;  %vm438_vm7 = vcmp.eq.s32.totalorder %v370_v41, %v1931_v53 }
  0x69   :  { %1660 = vmatprep.subr.msk.bf16.mxu0 %vm1605_vm10, %v1788_v61  ;;  %vm1637_vm13 = vmpackc.low %vm457_vm6, %vm456_vm5  ;;  %vm407_vm5 = vcmp.eq.s32.totalorder %v339_v40, %v1931_v53  ;;  %vm420_vm10 = vcmp.eq.s32.totalorder %v352_v43, %v1931_v53 }
  0x6a   :  { %1682 = vmatprep.subr.msk.bf16.mxu1 %vm1637_vm13, %v1788_v61  ;;  %vm1589_vm0 = vmpackc.low %vm409_vm9, %vm408_vm8  ;;  %vm439_vm8 = vcmp.eq.s32.totalorder %v371_v42, %v1931_v53  ;;  %vm452_vm13 = vcmp.eq.s32.totalorder %v384_v45, %v1931_v53 }
  0x6b   :  { %1661 = vmatpush3.bf16.msk.msra.mxu0 %vm1589_vm0, %v1788_v61  ;;  %vm1621_vm3 = vmpackc.low %vm441_vm12, %vm440_vm11  ;;  %vm421_vm11 = vcmp.eq.s32.totalorder %v353_v44, %v1931_v53  ;;  %vm404_vm0 = vcmp.eq.s32.totalorder %v1907_v35, %v1931_v53 }
  0x6c   :  { %1683 = vmatpush3.bf16.msk.msra.mxu1 %vm1621_vm3, %v1788_v61  ;;  %vm1607_vm6 = vmpackc.low %vm423_vm15, %vm422_vm14  ;;  %vm453_vm14 = vcmp.eq.s32.totalorder %v385_v46, %v1931_v53  ;;  %vm405_vm3 = vcmp.eq.s32.totalorder %v337_v47, %v1931_v53 }
  0x6d   :  { %1662 = vmatprep.subr.msk.bf16.mxu0 %vm1607_vm6, %v1788_v61  ;;  %vm1639_vm9 = vmpackc.low %vm455_vm2, %vm454_vm1  ;;  %vm436_vm2 = vcmp.eq.s32.totalorder %v368_v48, %v1931_v53  ;;  %vm437_vm6 = vcmp.eq.s32.totalorder %v369_v50, %v1931_v53  ;;  %v40_v53 = vld [vmem:[%s2791_s0 + $0x8] sm:$0x77] }
  0x6e   :  { %1684 = vmatprep.subr.msk.bf16.mxu1 %vm1639_vm9, %v1788_v61  ;;  %vm1591_vm12 = vmpackc.low %vm407_vm5, %vm406_vm4  ;;  %v59_v60 = vrot.slane %v40_v53, %v1914_v39  ;;  %v151_v63 = vrot.slane %v40_v53, %v142_v54  ;;  %v155_v2 = vrot.slane %v40_v53, %v146_v55  ;;  %v103_v8 = vrot.slane %v40_v53, %v94_v56  ;;  %v2196_v55 = vld [vmem:[%s2794_s3] sm:$0xff] }
  0x6f   :  { %1663 = vmatpush3.bf16.msk.msra.mxu0 %vm1591_vm12, %v1788_v61  ;;  %vm1623_vm15 = vmpackc.low %vm439_vm8, %vm438_vm7  ;;  %v107_v9 = vrot.slane %v40_v53, %v98_v57  ;;  %vm2797_vm8 = vcmask 64512   ;;  %v1789_v57 = vmov 8   ;;  %vm712_vm9 = vcmask 519168  }
  0x70   :  { %1685 = vmatpush3.bf16.msk.msra.mxu1 %vm1623_vm15, %v1788_v61  ;;  %vm1609_vm1 = vmpackc.low %vm421_vm11, %vm420_vm10  ;;  %v79_v35 = vrot.slane %v59_v60, %v1914_v39  ;;  %v171_v15 = vrot.slane %v151_v63, %v142_v54  ;;  %v175_v17 = vrot.slane %v155_v2, %v142_v54  ;;  %v123_v20 = vrot.slane %v103_v8, %v94_v56 }
  0x71   :  { %1664 = vmatprep.subr.msk.bf16.mxu0 %vm1609_vm1, %v1788_v61  ;;  %vm1641_vm4 = vmpackc.low %vm453_vm14, %vm452_vm13  ;;  %v127_v22 = vrot.slane %v107_v9, %v94_v56  ;;  %v2203_v56 = vld [vmem:[%s2794_s3 + $0x8] sm:$0xff]  ;;  %1752 = vset.pattern.permute.xlu0 %v1789_v57  ;;  %vm334_vm10 = vcmp.ge.s32.totalorder %v1924_v49, 0  ;;  %vm743_vm12 = vcmask 1043456   ;;  %v872_v49 = vadd.f32 4.0, %v1840_v6 }
  0x72   :  { %1686 = vmatprep.subr.msk.bf16.mxu1 %vm1641_vm4, %v1788_v61  ;;  %vm1593_vm5 = vmpackc.low %vm405_vm3, %vm404_vm0  ;;  %1751 = vset.pattern.permute.xlu1 %v1789_v57 }
  0x73   :  { %1665 = vmatpush3.bf16.msk.msra.mxu0 %vm1593_vm5, %v1788_v61  ;;  %vm1625_vm7 = vmpackc.low %vm437_vm6, %vm436_vm2  ;;  %752 = vperm.xlu0 %1752, %v2203_v56  }
  0x74   :  { %1687 = vmatpush3.bf16.msk.msra.mxu1 %vm1625_vm7, %v1788_v61  ;;  %v63_v61 = vrot.slane %v40_v53, %v54_v51  ;;  %747 = vperm.xlu1 %1751, %v2196_v55  }
  0x76   :  { %v83_v12 = vrot.slane %v63_v61, %v1914_v39 }
  0x78   :  { %757 = vperm.xlu1 %1751, %v2210_v58  }
  0x7c   :  { %762 = vperm.xlu1 %1751, %v2216_v59  }
  0x8c   :  { %v44_v13 = vpop.permute.xlu0 %43  ;;  %v138_v23 = vpop.permute.xlu1 %137 }
  0x8d   :  { %v84_v24 = vmul.f32 %v71_v10, %v44_v13  ;;  %v85_v25 = vmul.f32 %v75_v11, %v44_v13  ;;  %v86_v7 = vmul.f32 %v79_v35, %v44_v13  ;;  %v87_v26 = vmul.f32 %v83_v12, %v44_v13 }
  0x8e   :  { %v176_v28 = vmul.f32 %v163_v14, %v138_v23  ;;  %v178_v29 = vmul.f32 %v171_v15, %v138_v23  ;;  %v177_v30 = vmul.f32 %v167_v16, %v138_v23  ;;  %v179_v31 = vmul.f32 %v175_v17, %v138_v23 }
  0x91   :  { %v90_v27 = vpop.permute.xlu0 %89  ;;  %v186_v41 = vpop.permute.xlu1 %185 }
  0x92   :  { %v128_v32 = vmul.f32 %v115_v18, %v90_v27  ;;  %v129_v33 = vmul.f32 %v119_v19, %v90_v27  ;;  %v130_v21 = vmul.f32 %v123_v20, %v90_v27  ;;  %v131_v34 = vmul.f32 %v127_v22, %v90_v27 }
  0x93   :  { %v732_v27 = vsel %vm334_vm10, 1, %v1784_v1 }
  0x94   :  { %v132_v36 = vadd.f32 %v128_v32, %v84_v24  ;;  %v134_v37 = vadd.f32 %v130_v21, %v86_v7  ;;  %v133_v38 = vadd.f32 %v129_v33, %v85_v25  ;;  %v135_v40 = vadd.f32 %v131_v34, %v87_v26  ;;  %v739_v32 = vld [vmem:[%s2792_s1] sm:$0xf]  ;;  %s1790_s1 = smov 119  }
  0x95   :  { %v863_v34 = vadd.f32 4.0, %v1835_v5 }
  0x96   :  { %v181_v42 = vadd.f32 %v177_v30, %v133_v38  ;;  %v183_v43 = vadd.f32 %v179_v31, %v135_v40  ;;  %v180_v44 = vadd.f32 %v176_v28, %v132_v36  ;;  %v182_v45 = vadd.f32 %v178_v29, %v134_v37 }
  0x97   :  { %v736_v28 = vrot.slane %v732_v27, %v1914_v39  ;;  %v873_v36 = vmul.f32 0.5, %v872_v49  ;;  %v865_v37 = vmul.f32 0.5, %v863_v34 }
  0x98   :  { %v189_v46 = vadd.f32 %v186_v41, %v181_v42  ;;  %v191_v47 = vadd.f32 %v186_v41, %v183_v43  ;;  %v188_v48 = vadd.f32 %v186_v41, %v180_v44  ;;  %v190_v50 = vadd.f32 %v186_v41, %v182_v45 }
  0x99   :  { %vm737_vm11 = vcmp.eq.s32.totalorder %v736_v28, 1  ;;  %v874_v38 = vfloor.f32 %v873_v36  ;;  %v866_v40 = vfloor.f32 %v865_v37 }
  0x9a   :  { %v629_v51 = vpack.c.bf16 %v189_v46, %v189_v46  ;;  %v631_v52 = vpack.c.bf16 %v191_v47, %v191_v47  ;;  %v628_v53 = vpack.c.bf16 %v188_v48, %v188_v48  ;;  %v630_v54 = vpack.c.bf16 %v190_v50, %v190_v50 }
  0x9b   :  { %v1734_v41 = vtrunc.f32 %v874_v38  ;;  %v1732_v42 = vtrunc.f32 %v866_v40 }
  0x9c   :  { %664 = vmatprep.mubr.bf16.mxu0 %v629_v51  ;;  %704 = vmatprep.mubr.bf16.mxu1 %v631_v52 }
  0x9d   :  { %665 = vmatmul.mubr.bf16.vlgmr.msra.gmra.mxu0 %v628_v53  ;;  %705 = vmatmul.mubr.bf16.vlgmr.msra.gmra.mxu1 %v630_v54  ;;  %v1735_v43 = vcvt.f32.s32 %v1734_v41  ;;  %v1733_v44 = vcvt.f32.s32 %v1732_v42 }
  0x9e   :  { %1707 = vmatprep.mubr.msk.f32.mxu0 %vm2797_vm8, %v2196_v55 }
  0x9f   :  { %vm876_vm13 = vcmp.gt.s32.totalorder %v1735_v43, 0  ;;  %vm868_vm14 = vcmp.gt.s32.totalorder %v1733_v44, 0 }
  0xa0   :  { %v877_v45 = vsel %vm876_vm13, %v1735_v43, 0  ;;  %v869_v46 = vsel %vm868_vm14, %v1733_v44, 0 }
  0xa1   :  { %vm878_vm15 = vcmp.lt.s32.totalorder %v877_v45, 3  ;;  %vm870_vm0 = vcmp.lt.s32.totalorder %v869_v46, 3 }
  0xa2   :  { %v879_v47 = vsel %vm878_vm15, %v877_v45, 3  ;;  %v871_v50 = vsel %vm870_vm0, %v869_v46, 3 }
  0xa3   :  { %v880_v48 = vmul.u32 4, %v879_v47 }
  0xa5   :  { %v2235_v6 = vadd.s32 %v880_v48, %v871_v50 }
  0xa7   :  { %vm906_vm3 = vcmp.eq.s32.totalorder %v2235_v6, 1  ;;  %vm882_vm1 = vcmp.eq.s32.totalorder %v2235_v6, 0  ;;  %vm929_vm2 = vcmp.eq.s32.totalorder %v2235_v6, 2  ;;  %vm975_vm6 = vcmp.eq.s32.totalorder %v2235_v6, 4 }
  0xa8   :  { %v907_v5 = vsel %vm906_vm3, 1, %v1784_v1  ;;  %v883_v51 = vsel %vm882_vm1, 1, %v1784_v1  ;;  %v930_v52 = vsel %vm929_vm2, 1, %v1784_v1  ;;  %v976_v53 = vsel %vm975_vm6, 1, %v1784_v1 }
  0xa9   :  { %v911_v57 = vrot.slane %v907_v5, %v1914_v39  ;;  %vm952_vm4 = vcmp.eq.s32.totalorder %v2235_v6, 3  ;;  %vm1228_vm5 = vcmp.eq.s32.totalorder %v2235_v6, 15  ;;  %vm998_vm7 = vcmp.eq.s32.totalorder %v2235_v6, 5 }
  0xaa   :  { %vm1044_vm15 = vcmp.eq.s32.totalorder %v2235_v6, 7  ;;  %vm1067_vm0 = vcmp.eq.s32.totalorder %v2235_v6, 8  ;;  %vm1090_vm3 = vcmp.eq.s32.totalorder %v2235_v6, 9  ;;  %vm1113_vm1 = vcmp.eq.s32.totalorder %v2235_v6, 10 }
  0xab   :  { %v1045_v28 = vsel %vm1044_vm15, 1, %v1784_v1  ;;  %v1114_v49 = vsel %vm1113_vm1, 1, %v1784_v1  ;;  %vm1205_vm15 = vcmp.eq.s32.totalorder %v2235_v6, 14 }
  0xac   :  { %v1049_v40 = vrot.slane %v1045_v28, %v1914_v39  ;;  %v1118_v44 = vrot.slane %v1114_v49, %v1914_v39 }
  0xee   :  { %v753_v54 = vpop.permute.xlu0 %752 }
 0x15d   :  { %v1666_v60 = vpop.f32.mrf.mxu0  ;;  %v1688_v61 = vpop.f32.mrf.mxu1 }
 0x15f   :  { %v1667_v62 = vpop.f32.mrf.mxu0  ;;  %v1689_v63 = vpop.f32.mrf.mxu1 }
 0x160   :  { %v1668_v0 = vadd.f32 %v1667_v62, %v1666_v60  ;;  %v1690_v2 = vadd.f32 %v1689_v63, %v1688_v61  ;;  %v887_v60 = vrot.slane %v883_v51, %v1914_v39  ;;  %v934_v61 = vrot.slane %v930_v52, %v1914_v39 }
 0x161   :  { %v1669_v3 = vpop.f32.mrf.mxu0  ;;  %v1691_v4 = vpop.f32.mrf.mxu1  ;;  %v980_v63 = vrot.slane %v976_v53, %v1914_v39 }
 0x162   :  { %v707_v8 = vadd.f32 %v1690_v2, %v1668_v0  ;;  %v748_v2 = vpop.permute.xlu1 %747  ;;  %v953_v3 = vsel %vm952_vm4, 1, %v1784_v1  ;;  %v1229_v4 = vsel %vm1228_vm5, 1, %v1784_v1  ;;  %vm2258_vm10 = vcmp.eq.s32.totalorder %v887_v60, 1 }
 0x163   :  { %v1670_v9 = vpop.f32.mrf.mxu0  ;;  %v1692_v10 = vpop.f32.mrf.mxu1  ;;  %vm2265_vm13 = vcmp.eq.s32.totalorder %v934_v61, 1  ;;  %vm2269_vm14 = vcmp.eq.s32.totalorder %v980_v63, 1  ;;  %vm1136_vm4 = vcmp.eq.s32.totalorder %v2235_v6, 11 }
 0x164   :  { %v713_v11 = vsel %vm712_vm9, %v707_v8, -inf  ;;  %v1137_v45 = vsel %vm1136_vm4, 1, %v1784_v1 }
 0x165   :  { %v714_v35 = vrot.slane %v713_v11, 4  ;;  %v1141_v60 = vrot.slane %v1137_v45, %v1914_v39 }
 0x167   :  { %v715_v12 = vmax.f32 %v713_v11, %v714_v35 }
 0x169   :  { %v716_v13 = vrot.slane %v715_v12, 2 }
 0x16b   :  { %v717_v14 = vmax.f32 %v715_v12, %v716_v13  ;;  %v957_v13 = vrot.slane %v953_v3, %v1914_v39 }
 0x16d   :  { %v718_v15 = vrot.slane %v717_v14, 1  ;;  %vm2295_vm2 = vcmp.eq.s32.totalorder %v957_v13, 1 }
 0x16f   :  { %v719_v16 = vmax.f32 %v717_v14, %v718_v15  ;;  %v1233_v14 = vrot.slane %v1229_v4, %v1914_v39  ;;  %v999_v15 = vsel %vm998_vm7, 1, %v1784_v1  ;;  %vm1159_vm7 = vcmp.eq.s32.totalorder %v2235_v6, 12 }
 0x170   :  { %v1003_v27 = vrot.slane %v999_v15, %v1914_v39  ;;  %v1160_v61 = vsel %vm1159_vm7, 1, %v1784_v1 }
 0x171   :  { %v720_v17 = vsub.f32 %v707_v8, %v719_v16  ;;  %v2807_v8 = vmov 0  ;;  %vm2299_vm6 = vcmp.eq.s32.totalorder %v1233_v14, 1 }
 0x172   :  { %vm2321_vm5 = vcmp.eq.s32.totalorder %v1003_v27, 1 }
 0x173   :  { %v721_v18 = vmul.f32 1.442695, %v720_v17 }
 0x175   :  { %1757 = vpow2.f32 %v721_v18  ;;  %v758_v18 = vpop.permute.xlu1 %757 }
 0x179   :  { %v763_v38 = vpop.permute.xlu1 %762 }
 0x182   :  { %v1758_v19 = vpop.eup %1757 }
 0x183   :  { %v723_v20 = vsel %vm712_vm9, %v1758_v19, 0.0  ;;  %vm2254_vm9 = vcmp.eq.s32.totalorder %v911_v57, 1 }
 0x184   :  { %v724_v22 = vrot.slane %v723_v20, 4  ;;  %v2808_v8 = vsel %vm2254_vm9, 4294967295, %v2807_v8 }
 0x186   :  { %v725_v23 = vadd.f32 %v724_v22, %v723_v20 }
 0x188   :  { %v726_v24 = vrot.slane %v725_v23, 2 }
 0x18a   :  { %v727_v25 = vadd.f32 %v726_v24, %v725_v23 }
 0x18c   :  { %v728_v7 = vrot.slane %v727_v25, 1 }
 0x18e   :  { %v729_v26 = vadd.f32 %v728_v7, %v727_v25 }
 0x190   :  { %1759 = vrcp.f32 %v729_v26  ;;  %v2817_v26 = vmov 0 }
 0x191   :  { %v2818_v26 = vsel %vm2299_vm6, 4294967295, %v2817_v26 }
 0x19d   :  { %v1760_v29 = vpop.eup %1759 }
 0x19e   :  { %v731_v30 = vmul.f32 %v1760_v29, %v1758_v19 }
 0x1a0   :  { %v738_v31 = vsel %vm737_vm11, %v731_v30, 0.0  ;;  %vm1021_vm11 = vcmp.eq.s32.totalorder %v2235_v6, 6  ;;  %v1068_v30 = vsel %vm1067_vm0, 1, %v1784_v1 }
 0x1a1   :  { %v741_v33 = vrot.slane %v738_v31, 4  ;;  %v1022_v19 = vsel %vm1021_vm11, 1, %v1784_v1  ;;  %v1091_v31 = vsel %vm1090_vm3, 1, %v1784_v1  ;;  %v1072_v42 = vrot.slane %v1068_v30, %v1914_v39 }
 0x1a2   :  { %v1026_v29 = vrot.slane %v1022_v19, %v1914_v39  ;;  %v1095_v43 = vrot.slane %v1091_v31, %v1914_v39  ;;  %vm1182_vm11 = vcmp.eq.s32.totalorder %v2235_v6, 13  ;;  %vm2344_vm3 = vcmp.eq.s32.totalorder %v1049_v40, 1 }
 0x1a3   :  { %v744_v21 = vsel %vm743_vm12, %v739_v32, %v741_v33  ;;  %vm2798_vm12 = vcmask 523264   ;;  %vm2348_vm1 = vcmp.eq.s32.totalorder %v1072_v42, 1  ;;  %v2835_v42 = vmov 0 }
 0x1a4   :  { %1705 = vmatprep.subr.mxu0 %v744_v21  ;;  %vm2340_vm0 = vcmp.eq.s32.totalorder %v1026_v29, 1  ;;  %vm2352_vm4 = vcmp.eq.s32.totalorder %v1095_v43, 1 }
 0x1a5   :  { %1706 = vmatpush3.msra.mxu0 %v744_v21 }
 0x1a6   :  { %1708 = vmatmul.mubr.msk.f32.vlgmr.msra.gmra.mxu0 %vm2797_vm8, %v2203_v56 }
 0x1a7   :  { %1710 = vmatprep.mubr.msk.f32.mxu0 %vm2797_vm8, %v2210_v58 }
 0x1aa   :  { %1711 = vmatmul.mubr.msk.f32.gmra.mxu0 %vm2797_vm8, %v2216_v59  ;;  %vm2360_vm8 = vcmp.eq.s32.totalorder %v1118_v44, 1 }
 0x266   :  { %v1709_v62 = vpop.f32.mrf.mxu0 }
 0x267   :  { %v846_v0 = vadd.f32 %v1709_v62, %v753_v54 }
 0x268   :  { %v840_v35 = vpop.f32.mrf.mxu0 }
 0x269   :  { %v2263_v10 = vmax.f32 %v846_v0, 0.0  ;;  %v841_v23 = vadd.f32 %v840_v35, %v748_v2  ;;  %v1183_v0 = vsel %vm1182_vm11, 1, %v1784_v1  ;;  %v1206_v2 = vsel %vm1205_vm15, 1, %v1784_v1 }
 0x26a   :  { %v1712_v21 = vpop.f32.mrf.mxu0  ;;  %v1210_v19 = vrot.slane %v1206_v2, %v1914_v39  ;;  %vm2435_vm15 = vcmp.eq.s32.totalorder %v1141_v60, 1 }
 0x26b   :  { %v914_v16 = vsel %vm2254_vm9, %v2263_v10, 0.0  ;;  %v890_v17 = vsel %vm2258_vm10, %v2263_v10, 0.0  ;;  %v937_v24 = vsel %vm2265_vm13, %v2263_v10, 0.0  ;;  %v983_v25 = vsel %vm2269_vm14, %v2263_v10, 0.0 }
 0x26c   :  { %v920_v20 = vsel %vm2798_vm12, %v914_v16, -inf  ;;  %v897_v22 = vsel %vm2798_vm12, %v890_v17, -inf  ;;  %v943_v32 = vsel %vm2798_vm12, %v937_v24, -inf  ;;  %v989_v33 = vsel %vm2798_vm12, %v983_v25, -inf  ;;  %v850_v50 = vpop.f32.mrf.mxu0 }
 0x26d   :  { %921 = vmax.xlane.f32.xlu1 %v920_v20  ;;  %898 = vmax.xlane.f32.xlu0 %v897_v22  ;;  %v2312_v34 = vmax.f32 %v841_v23, 0.0  ;;  %v960_v36 = vsel %vm2295_vm2, %v2263_v10, 0.0  ;;  %v1236_v37 = vsel %vm2299_vm6, %v2263_v10, 0.0  ;;  %v856_v48 = vadd.f32 %v1712_v21, %v763_v38 }
 0x26e   :  { %v966_v46 = vsel %vm2798_vm12, %v960_v36, -inf  ;;  %v1242_v47 = vsel %vm2798_vm12, %v1236_v37, -inf  ;;  %v1006_v5 = vsel %vm2321_vm5, %v2263_v10, 0.0  ;;  %v851_v62 = vadd.f32 %v850_v50, %v758_v18 }
 0x26f   :  { %v889_v51 = vsel %vm2258_vm10, %v2312_v34, 0.0  ;;  %v2368_v3 = vmax.f32 %v856_v48, 0.0  ;;  %v1012_v4 = vsel %vm2798_vm12, %v1006_v5, -inf  ;;  %v1029_v13 = vsel %vm2340_vm0, %v2263_v10, 0.0 }
 0x270   :  { %v894_v35 = vsel %vm2798_vm12, %v889_v51, -inf  ;;  %v936_v14 = vsel %vm2265_vm13, %v2312_v34, 0.0  ;;  %v1052_v1 = vsel %vm2344_vm3, %v2263_v10, 0.0  ;;  %v959_v6 = vsel %vm2295_vm2, %v2312_v34, 0.0 }
 0x271   :  { %944 = vmax.xlane.f32.xlu1 %v943_v32  ;;  %990 = vmax.xlane.f32.xlu0 %v989_v33  ;;  %v1075_v15 = vsel %vm2348_vm1, %v2263_v10, 0.0  ;;  %v982_v16 = vsel %vm2269_vm14, %v2312_v34, 0.0  ;;  %v1164_v17 = vrot.slane %v1160_v61, %v1914_v39  ;;  %v1187_v18 = vrot.slane %v1183_v0, %v1914_v39 }
 0x272   :  { %v2393_v20 = vmax.f32 %v851_v62, 0.0  ;;  %v1035_v22 = vsel %vm2798_vm12, %v1029_v13, -inf  ;;  %v1098_v23 = vsel %vm2352_vm4, %v2263_v10, 0.0  ;;  %v1005_v24 = vsel %vm2321_vm5, %v2312_v34, 0.0 }
 0x273   :  { %v940_v25 = vsel %vm2798_vm12, %v936_v14, -inf  ;;  %v1058_v27 = vsel %vm2798_vm12, %v1052_v1, -inf  ;;  %v963_v28 = vsel %vm2798_vm12, %v959_v6, -inf  ;;  %v1081_v39 = vsel %vm2798_vm12, %v1075_v15, -inf }
 0x274   :  { %v986_v29 = vsel %vm2798_vm12, %v982_v16, -inf  ;;  %v1121_v30 = vsel %vm2360_vm8, %v2263_v10, 0.0  ;;  %v892_v31 = vsel %vm2258_vm10, %v2368_v3, 0.0  ;;  %v985_v32 = vsel %vm2269_vm14, %v2368_v3, 0.0 }
 0x275   :  { %967 = vmax.xlane.f32.xlu1 %v966_v46  ;;  %1243 = vmax.xlane.f32.xlu0 %v1242_v47  ;;  %v1104_v33 = vsel %vm2798_vm12, %v1098_v23, -inf  ;;  %v1009_v21 = vsel %vm2798_vm12, %v1005_v24, -inf  ;;  %vm2418_vm7 = vcmp.eq.s32.totalorder %v1164_v17, 1  ;;  %vm2422_vm11 = vcmp.eq.s32.totalorder %v1187_v18, 1 }
 0x276   :  { %v2833_v36 = vmov 0  ;;  %v2427_v37 = vsel %vm2798_vm12, %v892_v31, -inf  ;;  %v2430_v38 = vsel %vm2798_vm12, %v985_v32, -inf  ;;  %v1051_v40 = vsel %vm2344_vm3, %v2312_v34, 0.0 }
 0x277   :  { %v2834_v36 = vsel %vm2422_vm11, 4294967295, %v2833_v36  ;;  %v2836_v42 = vsel %vm2435_vm15, 4294967295, %v2835_v42  ;;  %v1008_v43 = vsel %vm2321_vm5, %v2368_v3, 0.0  ;;  %v915_v44 = vsel %vm2254_vm9, %v2393_v20, 0.0 }
 0x278   :  { %v1031_v45 = vsel %vm2340_vm0, %v2368_v3, 0.0  ;;  %vm2448_vm12 = vcmp.eq.s32.totalorder %v1210_v19, 1  ;;  %vm2839_vm6 = vcmask 523264   ;;  %v961_v5 = vsel %vm2295_vm2, %v2393_v20, 0.0 }
 0x279   :  { %1013 = vmax.xlane.f32.xlu1 %v1012_v4  ;;  %895 = vmax.xlane.f32.xlu0 %v894_v35  ;;  %v2453_v47 = vsel %vm2839_vm6, %v1008_v43, -inf  ;;  %vm2840_vm15 = vmmov %vm2839_vm6  ;;  %v1054_v60 = vsel %vm2344_vm3, %v2368_v3, 0.0  ;;  %v984_v61 = vsel %vm2269_vm14, %v2393_v20, 0.0  ;;  %v1077_v62 = vsel %vm2348_vm1, %v2368_v3, 0.0 }
 0x27a   :  { %v2456_v48 = vsel %vm2840_vm15, %v915_v44, -inf  ;;  %vm2841_vm11 = vmmov %vm2839_vm6  ;;  %v2477_v0 = vsel %vm2839_vm6, %v1054_v60, -inf  ;;  %v1007_v35 = vsel %vm2321_vm5, %v2393_v20, 0.0  ;;  %v1100_v13 = vsel %vm2352_vm4, %v2368_v3, 0.0 }
 0x27b   :  { %v2459_v50 = vsel %vm2841_vm11, %v1031_v45, -inf  ;;  %vm2842_vm9 = vmmov %vm2839_vm6  ;;  %v1030_v14 = vsel %vm2340_vm0, %v2393_v20, 0.0  ;;  %v1123_v1 = vsel %vm2360_vm8, %v2368_v3, 0.0  ;;  %v1053_v16 = vsel %vm2344_vm3, %v2393_v20, 0.0 }
 0x27c   :  { %v2465_v51 = vsel %vm2842_vm9, %v961_v5, -inf  ;;  %vm2843_vm11 = vmmov %vm2839_vm6  ;;  %v2504_v41 = vsel %vm2839_vm6, %v1030_v14, -inf  ;;  %v891_v18 = vsel %vm2258_vm10, %v2393_v20, 0.0  ;;  %v1076_v19 = vsel %vm2348_vm1, %v2393_v20, 0.0 }
 0x27d   :  { %1036 = vmax.xlane.f32.xlu1 %v1035_v22  ;;  %941 = vmax.xlane.f32.xlu0 %v940_v25  ;;  %v2480_v2 = vsel %vm2843_vm11, %v984_v61, -inf  ;;  %vm2844_vm9 = vmmov %vm2839_vm6  ;;  %v938_v22 = vsel %vm2265_vm13, %v2393_v20, 0.0  ;;  %v1099_v9 = vsel %vm2352_vm4, %v2393_v20, 0.0  ;;  %v1168_v5 = vsel %vm2418_vm7, %v2393_v20, 0.0 }
 0x27e   :  { %v2483_v4 = vsel %vm2844_vm9, %v1077_v62, -inf  ;;  %vm2845_vm15 = vmmov %vm2839_vm6  ;;  %v1215_v60 = vsel %vm2448_vm12, %v2368_v3, 0.0  ;;  %v1213_v57 = vsel %vm2448_vm12, %v2263_v10, 0.0  ;;  %v962_v46 = vsel %vm2295_vm2, %v2368_v3, 0.0 }
 0x27f   :  { %v2489_v12 = vsel %vm2845_vm15, %v1007_v35, -inf  ;;  %vm2846_vm14 = vmmov %vm2839_vm6  ;;  %vm1251_vm2 = vcmask 7168  }
 0x280   :  { %v2501_v6 = vsel %vm2846_vm14, %v1100_v13, -inf  ;;  %vm2847_vm5 = vmmov %vm2839_vm6  ;;  %vm2853_vm14 = vnez %v2834_v36  ;;  %v1214_v13 = vsel %vm2448_vm12, %v2393_v20, 0.0  ;;  %v939_v36 = vsel %vm2265_vm13, %v2368_v3, 0.0 }
 0x281   :  { %1059 = vmax.xlane.f32.xlu1 %v1058_v27  ;;  %964 = vmax.xlane.f32.xlu0 %v963_v28  ;;  %v2507_v15 = vsel %vm2847_vm5, %v1123_v1, -inf  ;;  %vm2848_vm11 = vmmov %vm2847_vm5  ;;  %v1169_v27 = vsel %vm2418_vm7, %v2368_v3, 0.0  ;;  %v1122_v28 = vsel %vm2360_vm8, %v2393_v20, 0.0  ;;  %v1191_v45 = vsel %vm2853_vm14, %v2393_v20, 0.0 }
 0x282   :  { %v2513_v17 = vsel %vm2848_vm11, %v1053_v16, -inf  ;;  %vm2849_vm9 = vmmov %vm2847_vm5  ;;  %v1190_v54 = vsel %vm2853_vm14, %v2263_v10, 0.0 }
 0x283   :  { %v2525_v53 = vsel %vm2849_vm9, %v891_v18, -inf  ;;  %vm2850_vm3 = vmmov %vm2847_vm5  ;;  %vm2857_vm9 = vnez %v2836_v42 }
 0x284   :  { %v2528_v23 = vsel %vm2850_vm3, %v1076_v19, -inf  ;;  %vm2851_vm15 = vmmov %vm2850_vm3  ;;  %v1145_v43 = vsel %vm2857_vm9, %v2393_v20, 0.0  ;;  %v1127_v1 = vsel %vm2850_vm3, %v1121_v30, -inf  ;;  %v1146_v11 = vsel %vm2857_vm9, %v2368_v3, 0.0 }
 0x285   :  { %1082 = vmax.xlane.f32.xlu1 %v1081_v39  ;;  %987 = vmax.xlane.f32.xlu0 %v986_v29  ;;  %v2531_v24 = vsel %vm2851_vm15, %v938_v22, -inf  ;;  %vm2852_vm10 = vmmov %vm2850_vm3  ;;  %v1192_v39 = vsel %vm2853_vm14, %v2368_v3, 0.0  ;;  %v2561_v44 = vsel %vm2850_vm3, %v1145_v43, -inf  ;;  %v1074_v22 = vsel %vm2348_vm1, %v2312_v34, 0.0 }
 0x286   :  { %v2537_v25 = vsel %vm2852_vm10, %v1099_v9, -inf  ;;  %vm2854_vm6 = vmmov %vm2850_vm3  ;;  %v1167_v9 = vsel %vm2418_vm7, %v2263_v10, 0.0  ;;  %v1120_v43 = vsel %vm2360_vm8, %v2312_v34, 0.0  ;;  %vm2873_vm8 = vnez %v2808_v8 }
 0x287   :  { %v2549_v29 = vsel %vm2854_vm6, %v1169_v27, -inf  ;;  %vm2855_vm5 = vmmov %vm2850_vm3  ;;  %v1097_v27 = vsel %vm2352_vm4, %v2312_v34, 0.0  ;;  %v913_v63 = vsel %vm2873_vm8, %v2312_v34, 0.0  ;;  %v916_v49 = vsel %vm2873_vm8, %v2368_v3, 0.0 }
 0x288   :  { %v2552_v31 = vsel %vm2855_vm5, %v1122_v28, -inf  ;;  %vm2856_vm11 = vmmov %vm2850_vm3  ;;  %vm2861_vm5 = vnez %v2818_v26  ;;  %vm1276_vm8 = vcmask 48128  }
 0x289   :  { %v2555_v32 = vsel %vm2856_vm11, %v1192_v39, -inf  ;;  %1105 = vmax.xlane.f32.xlu1 %v1104_v33  ;;  %1010 = vmax.xlane.f32.xlu0 %v1009_v21  ;;  %vm2858_vm15 = vmmov %vm2850_vm3  ;;  %v1238_v62 = vsel %vm2861_vm5, %v2368_v3, 0.0  ;;  %v1237_v14 = vsel %vm2861_vm5, %v2393_v20, 0.0  ;;  %v1144_v20 = vsel %vm2857_vm9, %v2263_v10, 0.0 }
 0x28a   :  { %v2573_v61 = vsel %vm2858_vm15, %v1191_v45, -inf  ;;  %vm2859_vm10 = vmmov %vm2850_vm3 }
 0x28b   :  { %v2576_v33 = vsel %vm2859_vm10, %v1168_v5, -inf  ;;  %vm2860_vm6 = vmmov %vm2850_vm3 }
 0x28c   :  { %v2579_v21 = vsel %vm2860_vm6, %v1215_v60, -inf  ;;  %vm2862_vm11 = vmmov %vm2850_vm3  ;;  %v1143_v60 = vsel %vm2857_vm9, %v2312_v34, 0.0  ;;  %vm1256_vm9 = vcmask 15360  }
 0x28d   :  { %v2585_v35 = vsel %vm2862_vm11, %v1238_v62, -inf  ;;  %vm2863_vm15 = vmmov %vm2850_vm3  ;;  %1128 = vmax.xlane.f32.xlu1 %v1127_v1 }
 0x28e   :  { %v1055_v16 = vsel %vm2863_vm15, %v1051_v40, -inf  ;;  %vm2864_vm10 = vmmov %vm2850_vm3  ;;  %v1078_v40 = vsel %vm2850_vm3, %v1074_v22, -inf }
 0x28f   :  { %v2600_v18 = vsel %vm2864_vm10, %v1214_v13, -inf  ;;  %vm2865_vm6 = vmmov %vm2850_vm3  ;;  %1056 = vmax.xlane.f32.xlu0 %v1055_v16  ;;  %v1028_v16 = vsel %vm2340_vm0, %v2312_v34, 0.0 }
 0x290   :  { %v2603_v19 = vsel %vm2865_vm6, %v1237_v14, -inf  ;;  %vm2866_vm11 = vmmov %vm2850_vm3  ;;  %v1166_v14 = vsel %vm2418_vm7, %v2312_v34, 0.0 }
 0x291   :  { %v1150_v30 = vsel %vm2866_vm11, %v1144_v20, -inf  ;;  %vm2867_vm15 = vmmov %vm2850_vm3  ;;  %v1189_v20 = vsel %vm2853_vm14, %v2312_v34, 0.0 }
 0x292   :  { %1151 = vmax.xlane.f32.xlu1 %v1150_v30  ;;  %v1173_v28 = vsel %vm2867_vm15, %v1167_v9, -inf  ;;  %vm2868_vm10 = vmmov %vm2850_vm3 }
 0x293   :  { %1079 = vmax.xlane.f32.xlu0 %v1078_v40  ;;  %v1101_v39 = vsel %vm2868_vm10, %v1097_v27, -inf  ;;  %vm2869_vm1 = vmmov %vm2850_vm3  ;;  %v1212_v40 = vsel %vm2448_vm12, %v2312_v34, 0.0  ;;  %v1235_v27 = vsel %vm2861_vm5, %v2312_v34, 0.0  ;;  %vm1261_vm5 = vcmask 23552  }
 0x294   :  { %v1196_v45 = vsel %vm2869_vm1, %v1190_v54, -inf  ;;  %vm2870_vm6 = vmmov %vm2869_vm1  ;;  %v1193_v30 = vsel %vm2869_vm1, %v1189_v20, -inf }
 0x295   :  { %v1124_v5 = vsel %vm2870_vm6, %v1120_v43, -inf  ;;  %vm2871_vm4 = vmmov %vm2869_vm1 }
 0x296   :  { %1174 = vmax.xlane.f32.xlu1 %v1173_v28  ;;  %v1219_v62 = vsel %vm2871_vm4, %v1213_v57, -inf  ;;  %vm2872_vm11 = vmmov %vm2869_vm1  ;;  %vm1266_vm4 = vcmask 31744  }
 0x297   :  { %1102 = vmax.xlane.f32.xlu0 %v1101_v39  ;;  %v1147_v13 = vsel %vm2872_vm11, %v1143_v60, -inf  ;;  %vm2874_vm3 = vmmov %vm2869_vm1  ;;  %vm1271_vm11 = vcmask 39936  }
 0x298   :  { %v917_v10 = vsel %vm2874_vm3, %v913_v63, -inf  ;;  %vm2875_vm15 = vmmov %vm2869_vm1  ;;  %vm1281_vm3 = vcmask 56320  }
 0x299   :  { %v1170_v1 = vsel %vm2875_vm15, %v1166_v14, -inf  ;;  %vm2876_vm10 = vmmov %vm2869_vm1  ;;  %vm1290_vm15 = vcmask 72704  }
 0x29a   :  { %1197 = vmax.xlane.f32.xlu1 %v1196_v45  ;;  %v1032_v22 = vsel %vm2876_vm10, %v1028_v16, -inf  ;;  %vm2877_vm7 = vmmov %vm2869_vm1  ;;  %vm2883_vm10 = vcmask 64512  }
 0x29b   :  { %1125 = vmax.xlane.f32.xlu0 %v1124_v5  ;;  %v926_v52 = vsel %vm2877_vm7, %v916_v49, -inf  ;;  %vm2878_vm0 = vmmov %vm2869_vm1  ;;  %vm1295_vm1 = vcmask 80896  }
 0x29c   :  { %v1216_v9 = vsel %vm2878_vm0, %v1212_v40, -inf  ;;  %vm2879_vm14 = vmmov %vm2878_vm0 }
 0x29d   :  { %v949_v8 = vsel %vm2879_vm14, %v939_v36, -inf  ;;  %vm2880_vm6 = vmmov %vm2878_vm0  ;;  %vm1305_vm14 = vcmask 97280  }
 0x29e   :  { %1220 = vmax.xlane.f32.xlu1 %v1219_v62  ;;  %v1239_v28 = vsel %vm2880_vm6, %v1235_v27, -inf  ;;  %vm2881_vm12 = vmmov %vm2878_vm0  ;;  %vm1310_vm6 = vcmask 105472  }
 0x29f   :  { %1148 = vmax.xlane.f32.xlu0 %v1147_v13  ;;  %v972_v39 = vsel %vm2881_vm12, %v962_v46, -inf  ;;  %vm2882_vm13 = vmmov %vm2878_vm0  ;;  %vm1300_vm0 = vcmask 89088   ;;  %vm1315_vm12 = vcmask 113664  }
 0x2a0   :  { %v1156_v26 = vsel %vm2882_vm13, %v1146_v11, -inf  ;;  %vm2884_vm7 = vmmov %vm2883_vm10  ;;  %vm1320_vm13 = vcmask 121856  }
 0x2a2   :  { %918 = vmax.xlane.f32.xlu1 %v917_v10 }
 0x2a3   :  { %1171 = vmax.xlane.f32.xlu0 %v1170_v1 }
 0x2a6   :  { %1033 = vmax.xlane.f32.xlu1 %v1032_v22 }
 0x2a7   :  { %1194 = vmax.xlane.f32.xlu0 %v1193_v30 }
 0x2aa   :  { %927 = vmax.xlane.f32.xlu1 %v926_v52 }
 0x2ab   :  { %1217 = vmax.xlane.f32.xlu0 %v1216_v9 }
 0x2ae   :  { %950 = vmax.xlane.f32.xlu1 %v949_v8 }
 0x2af   :  { %1240 = vmax.xlane.f32.xlu0 %v1239_v28 }
 0x2b2   :  { %973 = vmax.xlane.f32.xlu1 %v972_v39 }
 0x2b3   :  { %904 = vmax.xlane.f32.xlu0 %v2427_v37 }
 0x2b6   :  { %996 = vmax.xlane.f32.xlu1 %v2430_v38 }
 0x2b7   :  { %1157 = vmax.xlane.f32.xlu0 %v1156_v26 }
 0x2ba   :  { %1019 = vmax.xlane.f32.xlu1 %v2453_v47 }
 0x2bb   :  { %924 = vmax.xlane.f32.xlu0 %v2456_v48 }
 0x2be   :  { %1042 = vmax.xlane.f32.xlu1 %v2459_v50 }
 0x2bf   :  { %970 = vmax.xlane.f32.xlu0 %v2465_v51 }
 0x2c2   :  { %1065 = vmax.xlane.f32.xlu1 %v2477_v0 }
 0x2c3   :  { %993 = vmax.xlane.f32.xlu0 %v2480_v2 }
 0x2c6   :  { %1088 = vmax.xlane.f32.xlu1 %v2483_v4 }
 0x2c7   :  { %1016 = vmax.xlane.f32.xlu0 %v2489_v12 }
 0x2ca   :  { %1111 = vmax.xlane.f32.xlu1 %v2501_v6 }
 0x2cb   :  { %1039 = vmax.xlane.f32.xlu0 %v2504_v41 }
 0x2ce   :  { %1134 = vmax.xlane.f32.xlu1 %v2507_v15 }
 0x2cf   :  { %1062 = vmax.xlane.f32.xlu0 %v2513_v17 }
 0x2d2   :  { %901 = vmax.xlane.f32.xlu1 %v2525_v53 }
 0x2d3   :  { %1085 = vmax.xlane.f32.xlu0 %v2528_v23 }
 0x2d6   :  { %947 = vmax.xlane.f32.xlu1 %v2531_v24 }
 0x2d7   :  { %1108 = vmax.xlane.f32.xlu0 %v2537_v25 }
 0x2da   :  { %1180 = vmax.xlane.f32.xlu1 %v2549_v29 }
 0x2db   :  { %1131 = vmax.xlane.f32.xlu0 %v2552_v31 }
 0x2de   :  { %1203 = vmax.xlane.f32.xlu1 %v2555_v32 }
 0x2df   :  { %1154 = vmax.xlane.f32.xlu0 %v2561_v44 }
 0x2e2   :  { %1200 = vmax.xlane.f32.xlu1 %v2573_v61 }
 0x2e3   :  { %1177 = vmax.xlane.f32.xlu0 %v2576_v33 }
 0x2e6   :  { %1226 = vmax.xlane.f32.xlu1 %v2579_v21 }
 0x2e7   :  { %1249 = vmax.xlane.f32.xlu0 %v2585_v35 }
 0x2eb   :  { %1223 = vmax.xlane.f32.xlu0 %v2600_v18 }
 0x2ef   :  { %1246 = vmax.xlane.f32.xlu0 %v2603_v19 }
 0x2f6   :  { %v922_v7 = vpop.xlane.xlu1 %921  ;;  %v899_v34 = vpop.xlane.xlu0 %898 }
 0x2f7   :  { %1367 = vrot.lane.b32.xlu1 %v2216_v59, %s1790_s1  ;;  %v1253_v32 = vsel %vm1251_vm2, %v899_v34, %v922_v7 }
 0x2fa   :  { %v945_v3 = vpop.xlane.xlu1 %944  ;;  %v991_v37 = vpop.xlane.xlu0 %990 }
 0x2fb   :  { %1363 = vrot.lane.b32.xlu1 %v2203_v56, %s1790_s1  ;;  %v1258_v61 = vsel %vm1256_vm9, %v1253_v32, %v945_v3 }
 0x2fe   :  { %v968_v38 = vpop.xlane.xlu1 %967  ;;  %v2707_v42 = vpop.xlane.xlu0 %1243 }
 0x2ff   :  { %1361 = vrot.lane.b32.xlu1 %v2196_v55, %s1790_s1  ;;  %v1263_v21 = vsel %vm1261_vm5, %v1258_v61, %v968_v38 }
 0x300   :  { %v1268_v45 = vsel %vm1266_vm4, %v1263_v21, %v991_v37 }
 0x302   :  { %v1014_v47 = vpop.xlane.xlu1 %1013  ;;  %v896_v48 = vpop.xlane.xlu0 %895 }
 0x303   :  { %v1273_v57 = vsel %vm1271_vm11, %v1268_v45, %v1014_v47 }
 0x305   :  { %1365 = vrot.lane.b32.xlu0 %v2210_v58, %s1790_s1 }
 0x306   :  { %v1037_v50 = vpop.xlane.xlu1 %1036  ;;  %v942_v51 = vpop.xlane.xlu0 %941 }
 0x307   :  { %v1278_v62 = vsel %vm1276_vm8, %v1273_v57, %v1037_v50 }
 0x30a   :  { %v1060_v0 = vpop.xlane.xlu1 %1059  ;;  %v965_v2 = vpop.xlane.xlu0 %964 }
 0x30b   :  { %v1283_v10 = vsel %vm1281_vm3, %v1278_v62, %v1060_v0 }
 0x30e   :  { %v1083_v4 = vpop.xlane.xlu1 %1082  ;;  %v988_v12 = vpop.xlane.xlu0 %987 }
 0x30f   :  { %v1287_v16 = vsel %vm2884_vm7, %v1283_v10, %v1083_v4 }
 0x312   :  { %v1106_v59 = vpop.xlane.xlu1 %1105  ;;  %v1011_v6 = vpop.xlane.xlu0 %1010 }
 0x313   :  { %v1292_v22 = vsel %vm1290_vm15, %v1287_v16, %v1106_v59  ;;  %v1647_v16 = vld [vmem:[%s2794_s3 + $0x20] ss:$0 sm:$0xff]  ;;  %s1792_s3 = smov 125  }
 0x314   :  { %1374 = vrot.lane.b32.xlu1 %v1647_v16, %s1791_s18 }
 0x316   :  { %v1129_v41 = vpop.xlane.xlu1 %1128 }
 0x317   :  { %v1297_v49 = vsel %vm1295_vm1, %v1292_v22, %v1129_v41 }
 0x318   :  { %v1057_v15 = vpop.xlane.xlu0 %1056 }
 0x31b   :  { %v1152_v56 = vpop.xlane.xlu1 %1151 }
 0x31c   :  { %v1080_v17 = vpop.xlane.xlu0 %1079  ;;  %v1302_v36 = vsel %vm1300_vm0, %v1297_v49, %v1152_v56 }
 0x31f   :  { %v1175_v53 = vpop.xlane.xlu1 %1174 }
 0x320   :  { %v1103_v23 = vpop.xlane.xlu0 %1102  ;;  %v1307_v8 = vsel %vm1305_vm14, %v1302_v36, %v1175_v53 }
 0x323   :  { %v1198_v24 = vpop.xlane.xlu1 %1197 }
 0x324   :  { %v1126_v55 = vpop.xlane.xlu0 %1125  ;;  %v1312_v46 = vsel %vm1310_vm6, %v1307_v8, %v1198_v24 }
 0x327   :  { %v1221_v25 = vpop.xlane.xlu1 %1220 }
 0x328   :  { %v1149_v29 = vpop.xlane.xlu0 %1148  ;;  %v1317_v11 = vsel %vm1315_vm12, %v1312_v46, %v1221_v25 }
 0x329   :  { %v1322_v34 = vsel %vm1320_vm13, %v1317_v11, %v2707_v42 }
 0x32b   :  { %v919_v58 = vpop.xlane.xlu1 %918 }
 0x32c   :  { %v1172_v31 = vpop.xlane.xlu0 %1171  ;;  %v1252_v44 = vsel %vm1251_vm2, %v896_v48, %v919_v58 }
 0x32d   :  { %v1257_v33 = vsel %vm1256_vm9, %v1252_v44, %v942_v51 }
 0x32e   :  { %v1262_v35 = vsel %vm1261_vm5, %v1257_v33, %v965_v2 }
 0x32f   :  { %v1034_v18 = vpop.xlane.xlu1 %1033  ;;  %v1267_v19 = vsel %vm1266_vm4, %v1262_v35, %v988_v12 }
 0x330   :  { %v1195_v54 = vpop.xlane.xlu0 %1194  ;;  %v1272_v43 = vsel %vm1271_vm11, %v1267_v19, %v1011_v6 }
 0x331   :  { %v1277_v5 = vsel %vm1276_vm8, %v1272_v43, %v1034_v18 }
 0x332   :  { %v1282_v60 = vsel %vm1281_vm3, %v1277_v5, %v1057_v15 }
 0x333   :  { %v1286_v13 = vsel %vm2883_vm10, %v1282_v60, %v1080_v17  ;;  %v928_v63 = vpop.xlane.xlu1 %927  ;;  %vm2885_vm10 = vmmov %vm2884_vm7 }
 0x334   :  { %v1218_v14 = vpop.xlane.xlu0 %1217  ;;  %v1291_v1 = vsel %vm1290_vm15, %v1286_v13, %v1103_v23 }
 0x335   :  { %v1296_v20 = vsel %vm1295_vm1, %v1291_v1, %v1126_v55 }
 0x336   :  { %v1301_v30 = vsel %vm1300_vm0, %v1296_v20, %v1149_v29 }
 0x337   :  { %v1306_v40 = vsel %vm1305_vm14, %v1301_v30, %v1172_v31  ;;  %v951_v52 = vpop.xlane.xlu1 %950 }
 0x338   :  { %v1241_v9 = vpop.xlane.xlu0 %1240  ;;  %v1311_v27 = vsel %vm1310_vm6, %v1306_v40, %v1195_v54 }
 0x339   :  { %v1316_v28 = vsel %vm1315_vm12, %v1311_v27, %v1218_v14 }
 0x33a   :  { %v1321_v39 = vsel %vm1320_vm13, %v1316_v28, %v1241_v9 }
 0x33b   :  { %v974_v26 = vpop.xlane.xlu1 %973  ;;  %1329 = vxpose.xlu0.b32.start [1/4] (short) (narrow) %v1321_v39, 16 }
 0x33c   :  { %v905_v7 = vpop.xlane.xlu0 %904 }
 0x33d   :  { %v1255_v31 = vsel %vm1251_vm2, %v905_v7, %v928_v63 }
 0x33e   :  { %v1260_v61 = vsel %vm1256_vm9, %v1255_v31, %v951_v52 }
 0x33f   :  { %v997_v3 = vpop.xlane.xlu1 %996  ;;  %1330 = vxpose.xlu0.b32.cont [2/4] (short) (narrow) %v1322_v34, 16  ;;  %v1265_v18 = vsel %vm1261_vm5, %v1260_v61, %v974_v26 }
 0x340   :  { %v1158_v37 = vpop.xlane.xlu0 %1157  ;;  %v1270_v45 = vsel %vm1266_vm4, %v1265_v18, %v997_v3 }
 0x343   :  { %v1020_v38 = vpop.xlane.xlu1 %1019 }
 0x344   :  { %v925_v47 = vpop.xlane.xlu0 %924  ;;  %v1275_v5 = vsel %vm1271_vm11, %v1270_v45, %v1020_v38 }
 0x347   :  { %v1043_v48 = vpop.xlane.xlu1 %1042 }
 0x348   :  { %v971_v50 = vpop.xlane.xlu0 %970  ;;  %v1280_v57 = vsel %vm1276_vm8, %v1275_v5, %v1043_v48 }
 0x34b   :  { %v1066_v51 = vpop.xlane.xlu1 %1065 }
 0x34c   :  { %v994_v0 = vpop.xlane.xlu0 %993  ;;  %v1285_v63 = vsel %vm1281_vm3, %v1280_v57, %v1066_v51 }
 0x34f   :  { %v1089_v2 = vpop.xlane.xlu1 %1088 }
 0x350   :  { %v1017_v4 = vpop.xlane.xlu0 %1016 }
 0x353   :  { %v1112_v12 = vpop.xlane.xlu1 %1111 }
 0x354   :  { %v1040_v59 = vpop.xlane.xlu0 %1039 }
 0x357   :  { %v1135_v6 = vpop.xlane.xlu1 %1134 }
 0x358   :  { %v1063_v41 = vpop.xlane.xlu0 %1062 }
 0x35b   :  { %v902_v15 = vpop.xlane.xlu1 %901 }
 0x35c   :  { %v1086_v56 = vpop.xlane.xlu0 %1085  ;;  %v1254_v17 = vsel %vm1251_vm2, %v902_v15, %v925_v47  ;;  %vm2886_vm2 = vmmov %vm2884_vm7 }
 0x35d   :  { %v1289_v14 = vsel %vm2886_vm2, %v1285_v63, %v1089_v2 }
 0x35e   :  { %v1294_v10 = vsel %vm1290_vm15, %v1289_v14, %v1112_v12 }
 0x35f   :  { %v948_v42 = vpop.xlane.xlu1 %947  ;;  %v1299_v20 = vsel %vm1295_vm1, %v1294_v10, %v1135_v6 }
 0x360   :  { %v1109_v53 = vpop.xlane.xlu0 %1108  ;;  %v1259_v23 = vsel %vm1256_vm9, %v1254_v17, %v948_v42  ;;  %v1304_v40 = vsel %vm1300_vm0, %v1299_v20, %v1158_v37  ;;  %vm1377_vm9 = vcmask 261120  }
 0x361   :  { %v1264_v24 = vsel %vm1261_vm5, %v1259_v23, %v971_v50 }
 0x362   :  { %v1269_v55 = vsel %vm1266_vm4, %v1264_v24, %v994_v0 }
 0x363   :  { %v1274_v25 = vsel %vm1271_vm11, %v1269_v55, %v1017_v4  ;;  %v1181_v29 = vpop.xlane.xlu1 %1180 }
 0x364   :  { %v1132_v58 = vpop.xlane.xlu0 %1131  ;;  %v1279_v32 = vsel %vm1276_vm8, %v1274_v25, %v1040_v59  ;;  %v1309_v9 = vsel %vm1305_vm14, %v1304_v40, %v1181_v29 }
 0x365   :  { %v1284_v44 = vsel %vm1281_vm3, %v1279_v32, %v1063_v41 }
 0x366   :  { %v1288_v35 = vsel %vm2885_vm10, %v1284_v44, %v1086_v56 }
 0x367   :  { %v1204_v33 = vpop.xlane.xlu1 %1203  ;;  %v1293_v43 = vsel %vm1290_vm15, %v1288_v35, %v1109_v53 }
 0x368   :  { %v1155_v21 = vpop.xlane.xlu0 %1154  ;;  %v1298_v60 = vsel %vm1295_vm1, %v1293_v43, %v1132_v58  ;;  %v1314_v28 = vsel %vm1310_vm6, %v1309_v9, %v1204_v33 }
 0x369   :  { %v1303_v1 = vsel %vm1300_vm0, %v1298_v60, %v1155_v21 }
 0x36b   :  { %v1201_v19 = vpop.xlane.xlu1 %1200 }
 0x36c   :  { %v1178_v54 = vpop.xlane.xlu0 %1177 }
 0x36d   :  { %v1308_v22 = vsel %vm1305_vm14, %v1303_v1, %v1178_v54 }
 0x36e   :  { %v1313_v52 = vsel %vm1310_vm6, %v1308_v22, %v1201_v19 }
 0x36f   :  { %v1227_v62 = vpop.xlane.xlu1 %1226 }
 0x370   :  { %v1250_v13 = vpop.xlane.xlu0 %1249  ;;  %v1319_v39 = vsel %vm1315_vm12, %v1314_v28, %v1227_v62 }
 0x371   :  { %v1324_v26 = vsel %vm1320_vm13, %v1319_v39, %v1250_v13 }
 0x373   :  { %v1368_v49 = vpop.permute.xlu1 %1367 }
 0x374   :  { %v1224_v30 = vpop.xlane.xlu0 %1223  ;;  %1713 = vmatprep.subr.mxu1 %v1368_v49 }
 0x375   :  { %1714 = vmatpush3.msra.mxu1 %v1368_v49  ;;  %v1318_v36 = vsel %vm1315_vm12, %v1313_v52, %v1224_v30 }
 0x377   :  { %v1364_v8 = vpop.permute.xlu1 %1363 }
 0x378   :  { %v1247_v27 = vpop.xlane.xlu0 %1246 }
 0x379   :  { %v1323_v46 = vsel %vm1320_vm13, %v1318_v36, %v1247_v27 }
 0x37a   :  { %1331 = vxpose.xlu0.b32.cont [3/4] (short) (narrow) %v1323_v46, 16 }
 0x37b   :  { %v1362_v7 = vpop.permute.xlu1 %1361 }
 0x37c   :  { %v1366_v11 = vpop.permute.xlu0 %1365 }
 0x37d   :  { %1715 = vmatprep.subr.mxu1 %v1366_v11 }
 0x37e   :  { %1332 = vxpose.xlu0.b32.end [4/4] (short) (narrow) %v1324_v26, 16  ;;  %1716 = vmatpush3.msra.mxu1 %v1366_v11 }
 0x37f   :  { %1717 = vmatprep.subr.mxu1 %v1364_v8 }
 0x380   :  { %1718 = vmatpush3.msra.mxu1 %v1364_v8 }
 0x381   :  { %1719 = vmatprep.subr.mxu1 %v1362_v7 }
 0x382   :  { %1720 = vmatpush3.msra.mxu1 %v1362_v7 }
 0x386   :  { %v1375_v37 = vpop.permute.xlu1 %1374 }
 0x3ee   :  { %v1345_v34 = vpop.trf.xlu0 }
 0x3ef   :  { %1721 = vmatprep.mubr.msk.f32.mxu1 %vm1377_vm9, %v1345_v34 }
 0x3f2   :  { %v1346_v3 = vpop.trf.xlu0 }
 0x3f3   :  { %1722 = vmatmul.mubr.msk.f32.vlgmr.msra.gmra.mxu1 %vm1377_vm9, %v1346_v3 }
 0x4b3   :  { %v1723_v38 = vpop.f32.mrf.mxu1 }
 0x4b4   :  { %v1456_v47 = vadd.f32 %v1723_v38, %v1375_v37 }
 0x4b5   :  { %v1450_v48 = vpop.f32.mrf.mxu1 }
 0x4b6   :  { %v1460_v50 = vsub.f32 0.0, %v1456_v47  ;;  %v1451_v51 = vadd.f32 %v1450_v48, %v1375_v37 }
 0x4b8   :  { %v1463_v0 = vmul.f32 1.442695, %v1460_v50  ;;  %v1459_v2 = vsub.f32 0.0, %v1451_v51  ;;  %1475 = vrot.lane.b32.xlu1 %v1451_v51, %s1792_s3 }
 0x4ba   :  { %1761 = vpow2.f32 %v1463_v0  ;;  %v1461_v4 = vmul.f32 1.442695, %v1459_v2 }
 0x4bc   :  { %1763 = vpow2.f32 %v1461_v4  ;;  %1477 = vrot.lane.b32.xlu1 %v1456_v47, %s1792_s3 }
 0x4c7   :  { %v1762_v12 = vpop.eup %1761 }
 0x4c8   :  { %v1466_v59 = vadd.f32 1.0, %v1762_v12 }
 0x4c9   :  { %v1764_v6 = vpop.eup %1763 }
 0x4ca   :  { %1765 = vrcp.f32 %v1466_v59  ;;  %v1465_v41 = vadd.f32 1.0, %v1764_v6 }
 0x4cc   :  { %1767 = vrcp.f32 %v1465_v41 }
 0x4d7   :  { %v1766_v15 = vpop.eup %1765 }
 0x4d8   :  { %1472 = vst.msk [vmem:[%s2795_s4 + $0x8] sm:$0xff] %vm1261_vm5, %v1766_v15 }
 0x4d9   :  { %v1768_v56 = vpop.eup %1767 }
 0x4da   :  { %1471 = vst.msk [vmem:[%s2795_s4] sm:$0xff] %vm1261_vm5, %v1768_v56 }
 0x52a   :  { %v1476_v17 = vpop.permute.xlu1 %1475 }
 0x52b   :  { %1481 = vst.msk [vmem:[%s2796_s5] sm:$0xff] %vm1281_vm3, %v1476_v17 }
 0x52e   :  { %v1478_v42 = vpop.permute.xlu1 %1477 }
 0x52f   :  { %1482 = vst.msk [vmem:[%s2796_s5 + $0x8] sm:$0xff] %vm1281_vm3, %v1478_v42 }
 0x530   :  { %1491 = vsyncpa [#allocation3], 1 }

</bundles_post_ra>
